<compile_context>
chip_gen: v7x
topology: tpu7x:2x2x1
jax: 0.10.0
libtpu: 0.0.40
codegen_flags: <defaults>
</compile_context>

<pallas_src>
import math

import jax
import jax.numpy as jnp
from jax.experimental import pallas as pl
from jax.experimental.pallas import tpu as pltpu

LANE = 128


def _round_up(v, m):
    return (v + m - 1) // m * m


# ----------------------------- Pallas kernel ----------------------------------
def _conv3x3_kernel(x_ref, w_ref, b_ref, o_ref):
    """3x3 stride-1 conv on a kw-im2col'd, channels-last block.

    x_ref: (nb, Hp, W, K)   Hp = H_out + 2 (halo included), K = 3*Cin_p (kw-major)
    w_ref: (3, K, tn)       one (K, tn) matrix per kh tap
    b_ref: (1, tn)          float32 bias tile
    o_ref: (nb, TH, W, tn)  float32 output row-tile
    """
    nb, Hp, W, K = x_ref.shape
    TH = o_ref.shape[1]
    tn = o_ref.shape[3]

    j = pl.program_id(1)                       # row-tile index within the frame
    row0 = pl.multiple_of(j * TH, TH)

    acc = jnp.zeros((nb * TH * W, tn), jnp.float32)
    for dy in range(3):                        # kh taps: cheap major-axis slices
        patch = x_ref[:, pl.ds(row0 + dy, TH), :, :].reshape(nb * TH * W, K)
        acc = acc + jnp.dot(patch, w_ref[dy], preferred_element_type=jnp.float32)
    acc = acc + b_ref[...]
    o_ref[...] = acc.reshape(nb, TH, W, tn).astype(o_ref.dtype)


# ----------------------------- pallas_call wrapper -----------------------------
def conv2d_3x3(x_nchw, weight, bias, *, padding=1, compute_dtype=jnp.bfloat16):
    """Conv2d(Cin, Cout, kernel=3, stride=1, padding=padding) on NCHW f32 input.

    weight: torch layout (Cout, Cin, 3, 3); bias: (Cout,). bf16 operands by
    default (f32 accumulation); pass compute_dtype=jnp.float32 for exact f32.
    """
    B, Cin, H, W = x_nchw.shape
    Cout = weight.shape[0]
    assert weight.shape == (Cout, Cin, 3, 3)
    assert bias.shape == (Cout,)

    Cin_p = _round_up(Cin, LANE)
    Cout_p = _round_up(Cout, LANE)
    K = 3 * Cin_p

    Hp, Wp = H + 2 * padding, W + 2 * padding
    H_out, W_out = Hp - 2, Wp - 2

    # ---- wrapper-side layout prep: channels-last, halo pad, kw (dx) im2col ----
    # TODO(synk): in a full network keep activations NHWC end-to-end; the
    # NCHW<->NHWC transposes here exist only to match the torch module's API.
    x_cl = jnp.transpose(x_nchw, (0, 2, 3, 1))                         # (B,H,W,Cin)
    x_pad = jnp.pad(x_cl, ((0, 0), (padding, padding), (padding, padding),
                           (0, Cin_p - Cin)))
    x_im2 = jnp.concatenate([x_pad[:, :, dx:dx + W_out, :] for dx in range(3)],
                            axis=-1).astype(compute_dtype)             # (B,Hp,W_out,K)

    # torch (Cout, Cin, kh, kw) -> (kh, kw*Cin_p, Cout_p); kw-major matches im2col.
    w = jnp.transpose(weight, (2, 3, 1, 0))                            # (3,3,Cin,Cout)
    w = jnp.pad(w, ((0, 0), (0, 0), (0, Cin_p - Cin), (0, Cout_p - Cout)))
    w = w.reshape(3, K, Cout_p).astype(compute_dtype)
    b = jnp.pad(bias, (0, Cout_p - Cout)).astype(jnp.float32).reshape(1, Cout_p)

    # ---- tiling heuristics -----------------------------------------------------
    # frames per grid step: feed the MXU (>=256 rows) but keep >=2 batch steps
    # so megacore/pipelining still has work to split.
    nb = 1
    for d in range(1, B + 1):
        if B % d:
            continue
        if B >= 2 and B // d < 2:
            break
        nb = d
        if nb * H_out * W_out >= 256:
            break

    # output rows per grid step: bounds the f32 accumulator / per-step VMEM.
    TH = H_out
    while nb * TH * W_out > 2048 and TH % 2 == 0:
        TH //= 2

    tn = Cout_p if Cout_p <= 256 else 256      # full MXU width on v6e/v7x

    n_b, n_j, n_c = B // nb, H_out // TH, Cout_p // tn
    itemsize = jnp.dtype(compute_dtype).itemsize

    # constant weight block -> single-buffer once it is large (v7x 64 MiB VMEM).
    w_block_bytes = 3 * K * tn * itemsize
    w_kwargs = {}
    w_bufs = 2
    if w_block_bytes > 4 * 2**20:
        w_kwargs["pipeline_mode"] = pl.Buffered(1)
        w_bufs = 1

    step_bytes = (nb * Hp * W_out * K * itemsize * 2        # input, double-buffered
                  + w_block_bytes * w_bufs
                  + nb * TH * W_out * tn * 4 * 3            # out double-buffer + f32 acc
                  + tn * 4 * 2)
    vmem_limit = None
    if step_bytes > 30 * 2**20:
        vmem_limit = int(min(step_bytes * 1.3, 112 * 2**20))

    out = pl.pallas_call(
        _conv3x3_kernel,
        out_shape=jax.ShapeDtypeStruct((B, H_out, W_out, Cout_p), jnp.float32),
        grid=(n_b, n_j, n_c),
        in_specs=[
            pl.BlockSpec((nb, Hp, W_out, K), lambda i, j, c: (i, 0, 0, 0)),
            pl.BlockSpec((3, K, tn), lambda i, j, c: (0, 0, c), **w_kwargs),
            pl.BlockSpec((1, tn), lambda i, j, c: (0, c)),
        ],
        out_specs=pl.BlockSpec((nb, TH, W_out, tn), lambda i, j, c: (i, j, 0, c)),
        compiler_params=pltpu.CompilerParams(
            dimension_semantics=("parallel", "parallel", "parallel"),
            vmem_limit_bytes=vmem_limit),
    )(x_im2, w, b)

    out = out[..., :Cout]                                              # drop lane padding
    return jnp.transpose(out, (0, 3, 1, 2))                            # back to NCHW


# ----------------------------- module -------------------------------------------
class Downsample3D:
    """JAX/Pallas port of the reference Downsample3D module (forward pass only)."""

    def __init__(self, channels, use_conv, dims=2, stride=None, out_channels=None,
                 padding=1, *, key=None):
        self.channels = channels
        self.out_channels = out_channels or channels
        self.use_conv = use_conv
        self.dims = dims
        self.stride = 1                        # reference __init__ forces stride = 1
        self.padding = padding

        if use_conv:
            # TODO(synk): only the default dims=2 conv_nd path has a Pallas kernel;
            # the dims=1 / dims=3 conv variants are not translated here.
            assert dims == 2, "only dims=2 (Conv2d) is implemented"
            fan_in = channels * 3 * 3
            bound = 1.0 / math.sqrt(fan_in)
            k1, k2 = jax.random.split(key)
            self.weight = jax.random.uniform(
                k1, (self.out_channels, channels, 3, 3), jnp.float32, -bound, bound)
            self.bias = jax.random.uniform(
                k2, (self.out_channels,), jnp.float32, -bound, bound)
        else:
            assert self.channels == self.out_channels

    def __call__(self, x, *, compute_dtype=jnp.bfloat16):
        assert x.shape[1] == self.channels
        if self.use_conv:
            return conv2d_3x3(x, self.weight, self.bias, padding=self.padding,
                              compute_dtype=compute_dtype)
        # avg_pool_nd with kernel_size=stride=1 is an exact identity.
        return x


# ----------------------------- main ----------------------------------------------
if __name__ == "__main__":
    key = jax.random.PRNGKey(0)
    pkey, xkey = jax.random.split(key)

    B, C, H, W = 2, 4, 16, 16
    layer = Downsample3D(C, use_conv=True, dims=2, padding=1, key=pkey)
    x = jax.random.normal(xkey, (B, C, H, W), dtype=jnp.float32)

    fwd = jax.jit(lambda xx: layer(xx))
    out = jax.block_until_ready(fwd(x))

    # stride is forced to 1 in the reference, so spatial size is preserved.
    assert out.shape == (B, C, H, W), out.shape
    assert out.dtype == jnp.float32
    assert bool(jnp.all(jnp.isfinite(out)))

    # cross-check against XLA's conv (bf16 operands -> loose tolerance).
    ref = jax.lax.conv_general_dilated(
        x, layer.weight, window_strides=(1, 1), padding=((1, 1), (1, 1)),
        dimension_numbers=("NCHW", "OIHW", "NCHW")) + layer.bias[None, :, None, None]
    err = float(jnp.max(jnp.abs(out - ref)))
    assert err < 5e-2, f"max abs error {err}"

    # use_conv=False path: avg_pool(kernel=1, stride=1) == identity.
    ident = Downsample3D(C, use_conv=False)
    assert bool(jnp.all(ident(x) == x))

    print("KERNEL_OK")
</pallas_src>

<mosaic_0001>
module attributes {stable_mosaic.version = 11 : i64} {
  func.func @_conv3x3_kernel(%arg0: i32, %arg1: i32, %arg2: i32, %arg3: memref<1x18x16x384xbf16, #tpu.memory_space<vmem>>, %arg4: memref<3x384x128xbf16, #tpu.memory_space<vmem>>, %arg5: memref<1x128xf32, #tpu.memory_space<vmem>>, %arg6: memref<1x16x16x128xf32, #tpu.memory_space<vmem>>) attributes {dimension_semantics = [#tpu.dimension_semantics<parallel>, #tpu.dimension_semantics<parallel>, #tpu.dimension_semantics<parallel>], iteration_bounds = array<i64: 2, 1, 1>, scalar_prefetch = 0 : i64, scratch_operands = 0 : i64, tpu.core_type = #tpu.core_type<tc>, window_params = [{transform_indices = @transform_0, window_bounds = array<i64: 1, 18, 16, 384>}, {transform_indices = @transform_1, window_bounds = array<i64: 3, 384, 128>}, {transform_indices = @transform_2, window_bounds = array<i64: 1, 128>}, {transform_indices = @transform_3, window_bounds = array<i64: 1, 16, 16, 128>}]} {
    %c16_i32 = arith.constant 16 : i32
    %0 = arith.muli %arg1, %c16_i32 : i32
    %1 = tpu.assume_multiple %0, 16 : i32
    %cst = arith.constant 0.000000e+00 : f32
    %2 = vector.broadcast %cst : f32 to vector<256x128xf32>
    %c0_i32 = arith.constant 0 : i32
    %3 = arith.addi %1, %c0_i32 : i32
    %c0 = arith.constant 0 : index
    %4 = arith.index_cast %3 : i32 to index
    %c0_0 = arith.constant 0 : index
    %c0_1 = arith.constant 0 : index
    %5 = vector.load %arg3[%c0, %4, %c0_0, %c0_1] : memref<1x18x16x384xbf16, #tpu.memory_space<vmem>>, vector<1x16x16x384xbf16>
    %6 = vector.shape_cast %5 : vector<1x16x16x384xbf16> to vector<256x384xbf16>
    %c0_2 = arith.constant 0 : index
    %c0_3 = arith.constant 0 : index
    %c0_4 = arith.constant 0 : index
    %7 = vector.load %arg4[%c0_2, %c0_3, %c0_4] : memref<3x384x128xbf16, #tpu.memory_space<vmem>>, vector<1x384x128xbf16>
    %8 = vector.shape_cast %7 : vector<1x384x128xbf16> to vector<384x128xbf16>
    %cst_5 = arith.constant dense<0.000000e+00> : vector<256x128xf32>
    %9 = tpu.matmul %6, %8, %cst_5 {dimension_numbers = #tpu.dot_dimension_numbers<[1], [0], [0], [1], [0, 0, 1, 1], [], []>} : vector<256x384xbf16>, vector<384x128xbf16>, vector<256x128xf32> -> vector<256x128xf32>
    %10 = arith.addf %2, %9 : vector<256x128xf32>
    %c1_i32 = arith.constant 1 : i32
    %11 = arith.addi %1, %c1_i32 : i32
    %c0_6 = arith.constant 0 : index
    %12 = arith.index_cast %11 : i32 to index
    %c0_7 = arith.constant 0 : index
    %c0_8 = arith.constant 0 : index
    %13 = vector.load %arg3[%c0_6, %12, %c0_7, %c0_8] : memref<1x18x16x384xbf16, #tpu.memory_space<vmem>>, vector<1x16x16x384xbf16>
    %14 = vector.shape_cast %13 : vector<1x16x16x384xbf16> to vector<256x384xbf16>
    %c1 = arith.constant 1 : index
    %c0_9 = arith.constant 0 : index
    %c0_10 = arith.constant 0 : index
    %15 = vector.load %arg4[%c1, %c0_9, %c0_10] : memref<3x384x128xbf16, #tpu.memory_space<vmem>>, vector<1x384x128xbf16>
    %16 = vector.shape_cast %15 : vector<1x384x128xbf16> to vector<384x128xbf16>
    %cst_11 = arith.constant dense<0.000000e+00> : vector<256x128xf32>
    %17 = tpu.matmul %14, %16, %cst_11 {dimension_numbers = #tpu.dot_dimension_numbers<[1], [0], [0], [1], [0, 0, 1, 1], [], []>} : vector<256x384xbf16>, vector<384x128xbf16>, vector<256x128xf32> -> vector<256x128xf32>
    %18 = arith.addf %10, %17 : vector<256x128xf32>
    %c2_i32 = arith.constant 2 : i32
    %19 = arith.addi %1, %c2_i32 : i32
    %c0_12 = arith.constant 0 : index
    %20 = arith.index_cast %19 : i32 to index
    %c0_13 = arith.constant 0 : index
    %c0_14 = arith.constant 0 : index
    %21 = vector.load %arg3[%c0_12, %20, %c0_13, %c0_14] : memref<1x18x16x384xbf16, #tpu.memory_space<vmem>>, vector<1x16x16x384xbf16>
    %22 = vector.shape_cast %21 : vector<1x16x16x384xbf16> to vector<256x384xbf16>
    %c2 = arith.constant 2 : index
    %c0_15 = arith.constant 0 : index
    %c0_16 = arith.constant 0 : index
    %23 = vector.load %arg4[%c2, %c0_15, %c0_16] : memref<3x384x128xbf16, #tpu.memory_space<vmem>>, vector<1x384x128xbf16>
    %24 = vector.shape_cast %23 : vector<1x384x128xbf16> to vector<384x128xbf16>
    %cst_17 = arith.constant dense<0.000000e+00> : vector<256x128xf32>
    %25 = tpu.matmul %22, %24, %cst_17 {dimension_numbers = #tpu.dot_dimension_numbers<[1], [0], [0], [1], [0, 0, 1, 1], [], []>} : vector<256x384xbf16>, vector<384x128xbf16>, vector<256x128xf32> -> vector<256x128xf32>
    %26 = arith.addf %18, %25 : vector<256x128xf32>
    %c0_18 = arith.constant 0 : index
    %c0_19 = arith.constant 0 : index
    %27 = vector.load %arg5[%c0_18, %c0_19] : memref<1x128xf32, #tpu.memory_space<vmem>>, vector<1x128xf32>
    %28 = vector.broadcast %27 : vector<1x128xf32> to vector<256x128xf32>
    %29 = arith.addf %26, %28 : vector<256x128xf32>
    %30 = vector.shape_cast %29 : vector<256x128xf32> to vector<1x16x16x128xf32>
    %c0_20 = arith.constant 0 : index
    %c0_21 = arith.constant 0 : index
    %c0_22 = arith.constant 0 : index
    %c0_23 = arith.constant 0 : index
    %31 = vector.load %arg6[%c0_20, %c0_21, %c0_22, %c0_23] : memref<1x16x16x128xf32, #tpu.memory_space<vmem>>, vector<1x16x16x128xf32>
    tpu.vector_store %arg6[%c0_20, %c0_21, %c0_22, %c0_23], %30 {strides = array<i32>} : memref<1x16x16x128xf32, #tpu.memory_space<vmem>>, vector<1x16x16x128xf32>,
    return
  }
  func.func @transform_0(%arg0: i32, %arg1: i32, %arg2: i32) -> (i32, i32, i32, i32) {
    %c0_i32 = arith.constant 0 : i32
    %c0_i32_0 = arith.constant 0 : i32
    %c0_i32_1 = arith.constant 0 : i32
    %c0_i32_2 = arith.constant 0 : i32
    return %arg0, %c0_i32, %c0_i32_0, %c0_i32_1 : i32, i32, i32, i32
  }
  func.func @transform_1(%arg0: i32, %arg1: i32, %arg2: i32) -> (i32, i32, i32) {
    %c0_i32 = arith.constant 0 : i32
    %c0_i32_0 = arith.constant 0 : i32
    %c0_i32_1 = arith.constant 0 : i32
    return %c0_i32, %c0_i32_0, %arg2 : i32, i32, i32
  }
  func.func @transform_2(%arg0: i32, %arg1: i32, %arg2: i32) -> (i32, i32) {
    %c0_i32 = arith.constant 0 : i32
    %c0_i32_0 = arith.constant 0 : i32
    return %c0_i32, %arg2 : i32, i32
  }
  func.func @transform_3(%arg0: i32, %arg1: i32, %arg2: i32) -> (i32, i32, i32, i32) {
    %c0_i32 = arith.constant 0 : i32
    %c0_i32_0 = arith.constant 0 : i32
    return %arg0, %arg1, %c0_i32, %arg2 : i32, i32, i32, i32
  }
}

</mosaic_0001>

<bundles_post_ra>
// kernel: _lambda_.1
= control target key start
LH: loop header
LB: loop body
LE: loop exit
PB: predicated region body
PF: predicated region fallthrough
CT: control target
= control target key end

     0   :  { %s4424_s12 = smov 0   ;;  %s4426_s13 = smov 0   ;;  %s5304_s0 = inlined_call_operand.vmem [shape: bf16[2,18,16,384], index: 0, kind: input, shape index: {}]   ;;  %s5305_s1 = inlined_call_operand.vmem [shape: bf16[3,384,128], index: 1, kind: input, shape index: {}]   ;;  %s5306_s2 = inlined_call_operand.vmem [shape: f32[1,128], index: 2, kind: input, shape index: {}]   ;;  %s5307_s3 = inlined_call_operand.vmem [shape: f32[2,16,16,128], index: 3, kind: output, shape index: {}]  }
   0x1   :  { %s4428_s14 = smov 0  }
   0x2 LB: > { %s32_s15 = sadd.s32 1, %s4398_s13  ;;  %p3005_p0 = scmp.ge.s32.totalorder %s4402_s14, 1  ;;  %s4402_s14 = sphi %s4428_s14, %s13_s14   ;;  %s4398_s13 = sphi %s4426_s13, %s5313_s13   ;;  %s4394_s12 = sphi %s4424_s12, %s5312_s12  }
   0x3   : > { %p34_p1 = scmp.ge.s32.totalorder %s32_s15, 2  ;;  %p177_p2 = scmp.lt.s32.totalorder %s4402_s14, 3 }
   0x5   : > { %s5315_s15 = smov (%p34_p1, %s32_s15), 0  ;;  %p178_p3 = pnand %p3005_p0, %p177_p2 }
   0x7   : > { %181 = sbr.rel (%p178_p3) target bundleno = 552 (0x228), region = 32 }
   0xe   : > { %v4206_v0 = vld [vmem:[%s5305_s1 + $0x100] sm:$0xff]   ;;  %v4209_v3 = vld [vmem:[%s5305_s1 + $0x108] sm:$0xff]   ;;  %v4212_v6 = vld [vmem:[%s5305_s1 + $0x110] sm:$0xff]   ;;  %p216_p4 = scmp.lt.s32.totalorder %s4394_s12, 1 }
   0xf   : > { %v4450_v1 = vld [vmem:[%s5305_s1 + $0x140] sm:$0xff]   ;;  %3453 = vmatprep.subr.bf16.mxu0 %v4206_v0  ;;  %v4463_v4 = vld [vmem:[%s5305_s1 + $0x148] sm:$0xff]   ;;  %v4475_v7 = vld [vmem:[%s5305_s1 + $0x150] sm:$0xff]  }
  0x10   : > { %v4208_v2 = vld [vmem:[%s5305_s1 + $0xc0] sm:$0xff]   ;;  %4005 = vmatprep.subr.bf16.mxu1 %v4450_v1  ;;  %v4211_v5 = vld [vmem:[%s5305_s1 + $0xc8] sm:$0xff]   ;;  %v4214_v8 = vld [vmem:[%s5305_s1 + $0xd0] sm:$0xff]   ;;  %s5317_s12 = smov (!%p216_p4, %s4394_s12), 1 }
  0x11   : > { %3454 = vmatpush3.bf16.msra.mxu0 %v4208_v2  ;;  %4013 = vmatpush3.bf16.msra.mxu1 %v4450_v1  ;;  %v4215_v9 = vld [vmem:[%s5305_s1 + $0x118] sm:$0xff]   ;;  %v4218_v12 = vld [vmem:[%s5305_s1 + $0x120] sm:$0xff]   ;;  %v4221_v15 = vld [vmem:[%s5305_s1 + $0x128] sm:$0xff]   ;;  %s4181_s27 = smul.u32 432, %s5317_s12 }
  0x12   : > { %3455 = vmatprep.subr.bf16.mxu0 %v4209_v3  ;;  %4006 = vmatprep.subr.bf16.mxu1 %v4463_v4  ;;  %v4488_v10 = vld [vmem:[%s5305_s1 + $0x158] sm:$0xff]   ;;  %v4502_v13 = vld [vmem:[%s5305_s1 + $0x160] sm:$0xff]   ;;  %v4518_v16 = vld [vmem:[%s5305_s1 + $0x168] sm:$0xff]  }
  0x13   : > { %v4217_v11 = vld [vmem:[%s5305_s1 + $0xd8] sm:$0xff]   ;;  %v4220_v14 = vld [vmem:[%s5305_s1 + $0xe0] sm:$0xff]   ;;  %v4223_v17 = vld [vmem:[%s5305_s1 + $0xe8] sm:$0xff]   ;;  %s4540_s11 = scalar_lea.vmem %s5304_s0, %s4181_s27 }
  0x14   : > { %v4224_v18 = vld [vmem:[%s5305_s1 + $0x130] sm:$0xff]   ;;  %v4227_v21 = vld [vmem:[%s5305_s1 + $0x138] sm:$0xff]   ;;  %v4233_v24 = vld [vmem:[%s4540_s11 + $0xe0] ss:$12 sps:$4 sm:$0xff]  }
  0x15   : > { %3456 = vmatpush3.bf16.msra.mxu0 %v4211_v5  ;;  %4014 = vmatpush3.bf16.msra.mxu1 %v4463_v4  ;;  %v4532_v19 = vld [vmem:[%s5305_s1 + $0x170] sm:$0xff]   ;;  %v4549_v22 = vld [vmem:[%s5305_s1 + $0x178] sm:$0xff]   ;;  %v4235_v26 = vld [vmem:[%s5305_s1 + $0x40] sm:$0xff]  }
  0x16   : > { %3457 = vmatprep.subr.bf16.mxu0 %v4212_v6  ;;  %4007 = vmatprep.subr.bf16.mxu1 %v4475_v7  ;;  %v4226_v20 = vld [vmem:[%s5305_s1 + $0xf0] sm:$0xff]   ;;  %v4553_v23 = vld [vmem:[%s4540_s11 + $0x1c] ss:$12 sps:$4 sm:$0xff]   ;;  %v4566_v27 = vld [vmem:[%s4540_s11 + $0x18] ss:$12 sps:$4 sm:$0xff]  }
  0x17   : > { %908 = vmatprep.mubr.bf16.mxu0 %v4553_v23  ;;  %v4229_v25 = vld [vmem:[%s5305_s1 + $0xf8] sm:$0xff]   ;;  %3893 = vmatprep.mubr.bf16.mxu1 %v4233_v24  ;;  %v4236_v29 = vld [vmem:[%s5305_s1] sm:$0xff]   ;;  %v4237_v30 = vld [vmem:[%s5305_s1 + $0x48] sm:$0xff]  }
  0x18   : > { %v4234_v28 = vld [vmem:[%s4540_s11 + $0xf8] ss:$12 sps:$4 sm:$0xff]   ;;  %v4578_v31 = vld [vmem:[%s4540_s11 + $0x34] ss:$12 sps:$4 sm:$0xff]   ;;  %v4241_v32 = vld [vmem:[%s4540_s11 + $0x110] ss:$12 sps:$4 sm:$0xff]  }
  0x19   : > { %3458 = vmatpush3.bf16.msra.mxu0 %v4214_v8  ;;  %4015 = vmatpush3.bf16.msra.mxu1 %v4475_v7  ;;  %v4238_v33 = vld [vmem:[%s5305_s1 + $0x8] sm:$0xff]   ;;  %v4588_v34 = vld [vmem:[%s4540_s11 + $0x30] ss:$12 sps:$4 sm:$0xff]   ;;  %v4252_v43 = vld [vmem:[%s4540_s11 + $0x158] ss:$12 sps:$4 sm:$0xff]  }
  0x1a   : > { %3459 = vmatprep.subr.bf16.mxu0 %v4215_v9  ;;  %4008 = vmatprep.subr.bf16.mxu1 %v4488_v10  ;;  %v4244_v35 = vld [vmem:[%s5305_s1 + $0x50] sm:$0xff]   ;;  %v4246_v38 = vld [vmem:[%s5305_s1 + $0x58] sm:$0xff]   ;;  %v4250_v40 = vld [vmem:[%s4540_s11 + $0x140] ss:$12 sps:$4 sm:$0xff]  }
  0x1b   : > { %v4243_v36 = vld [vmem:[%s4540_s11 + $0x128] ss:$12 sps:$4 sm:$0xff]   ;;  %v4602_v39 = vld [vmem:[%s4540_s11 + $0x4c] ss:$12 sps:$4 sm:$0xff]   ;;  %v4253_v44 = vld [vmem:[%s5305_s1 + $0x60] sm:$0xff]  }
  0x1c   : > { %v4245_v37 = vld [vmem:[%s5305_s1 + $0x10] sm:$0xff]   ;;  %v4247_v41 = vld [vmem:[%s5305_s1 + $0x18] sm:$0xff]   ;;  %v4254_v45 = vld [vmem:[%s5305_s1 + $0x20] sm:$0xff]  }
  0x1d   : > { %3460 = vmatpush3.bf16.msra.mxu0 %v4217_v11  ;;  %4016 = vmatpush3.bf16.msra.mxu1 %v4488_v10  ;;  %v4613_v42 = vld [vmem:[%s4540_s11 + $0x48] ss:$12 sps:$4 sm:$0xff]   ;;  %v4628_v47 = vld [vmem:[%s4540_s11 + $0x64] ss:$12 sps:$4 sm:$0xff]   ;;  %v4641_v51 = vld [vmem:[%s4540_s11 + $0x60] ss:$12 sps:$4 sm:$0xff]  }
  0x1e   : > { %3461 = vmatprep.subr.bf16.mxu0 %v4218_v12  ;;  %4009 = vmatprep.subr.bf16.mxu1 %v4502_v13  ;;  %v4255_v46 = vld [vmem:[%s5305_s1 + $0x68] sm:$0xff]   ;;  %v4259_v48 = vld [vmem:[%s4540_s11 + $0x170] ss:$12 sps:$4 sm:$0xff]   ;;  %v4272_v58 = vld [vmem:[%s5305_s1 + $0x80] sm:$0xff]  }
  0x1f   : > { %v4256_v49 = vld [vmem:[%s5305_s1 + $0x28] sm:$0xff]   ;;  %v4262_v50 = vld [vmem:[%s5305_s1 + $0x70] sm:$0xff]   ;;  %v4264_v54 = vld [vmem:[%s5305_s1 + $0x78] sm:$0xff]  }
  0x20   : > { %v4261_v52 = vld [vmem:[%s4540_s11 + $0x188] ss:$12 sps:$4 sm:$0xff]   ;;  %v4270_v56 = vld [vmem:[%s4540_s11 + $0x4] ss:$12 sps:$4 sm:$0xff]   ;;  %v4265_v57 = vld [vmem:[%s5305_s1 + $0x38] sm:$0xff]  }
  0x21   : > { %3462 = vmatpush3.bf16.msra.mxu0 %v4220_v14  ;;  %4017 = vmatpush3.bf16.msra.mxu1 %v4502_v13  ;;  %v4263_v53 = vld [vmem:[%s5305_s1 + $0x30] sm:$0xff]   ;;  %v4653_v55 = vld [vmem:[%s4540_s11 + $0x7c] ss:$12 sps:$4 sm:$0xff]   ;;  %v4268_v59 = vld [vmem:[%s4540_s11] ss:$12 sps:$4 sm:$0xff]  }
  0x22   : > { %3463 = vmatprep.subr.bf16.mxu0 %v4221_v15  ;;  %4010 = vmatprep.subr.bf16.mxu1 %v4518_v16  ;;  %v4668_v60 = vld [vmem:[%s4540_s11 + $0x78] ss:$12 sps:$4 sm:$0xff]   ;;  %v4672_v61 = vld [vmem:[%s4540_s11 + $0x94] ss:$12 sps:$4 sm:$0xff]   ;;  %v4279_v62 = vld [vmem:[%s5305_s1 + $0x88] sm:$0xff]  }
  0x23   : > { %v4286_v63 = vld [vmem:[%s5305_s1 + $0x90] sm:$0xff]   ;;  %v4293_v2 = vld [vmem:[%s5305_s1 + $0x98] sm:$0xff]   ;;  %v4313_v5 = vld [vmem:[%s5305_s1 + $0x1c0] sm:$0xff]  }
  0x24   : > { %v4686_v0 = vld [vmem:[%s4540_s11 + $0x90] ss:$12 sps:$4 sm:$0xff]   ;;  %v4700_v3 = vld [vmem:[%s4540_s11 + $0xa8] ss:$12 sps:$4 sm:$0xff]   ;;  %v4722_v9 = vld [vmem:[%s4540_s11 + $0xc0] ss:$12 sps:$4 sm:$0xff]  }
  0x25   : > { %3464 = vmatpush3.bf16.msra.mxu0 %v4223_v17  ;;  %4018 = vmatpush3.bf16.msra.mxu1 %v4518_v16  ;;  %v4709_v6 = vld [vmem:[%s4540_s11 + $0xc4] ss:$12 sps:$4 sm:$0xff]   ;;  %v4328_v11 = vld [vmem:[%s5305_s1 + $0xb8] sm:$0xff]   ;;  %v4761_v17 = vld [vmem:[%s4540_s11 + $0x108] ss:$12 sps:$4 sm:$0xff]  }
  0x26   : > { %3465 = vmatprep.subr.bf16.mxu0 %v4224_v18  ;;  %4011 = vmatprep.subr.bf16.mxu1 %v4532_v19  ;;  %v4315_v8 = vld [vmem:[%s5305_s1 + $0xb0] sm:$0xff]   ;;  %v4735_v12 = vld [vmem:[%s4540_s11 + $0xd8] ss:$12 sps:$4 sm:$0xff]  }
  0x27   : > { %v4745_v14 = vld [vmem:[%s4540_s11 + $0xf0] ss:$12 sps:$4 sm:$0xff]   ;;  %v4748_v15 = vld [vmem:[%s4540_s11 + $0x10c] ss:$12 sps:$4 sm:$0xff]  }
  0x28   : > { %v4764_v18 = vld [vmem:[%s4540_s11 + $0x124] ss:$12 sps:$4 sm:$0xff]   ;;  %v4794_v24 = vld [vmem:[%s4540_s11 + $0x16c] ss:$12 sps:$4 sm:$0xff]  }
  0x29   : > { %3466 = vmatpush3.bf16.msra.mxu0 %v4226_v20  ;;  %4019 = vmatpush3.bf16.msra.mxu1 %v4532_v19  ;;  %v4774_v20 = vld [vmem:[%s4540_s11 + $0x13c] ss:$12 sps:$4 sm:$0xff]  }
  0x2a   : > { %3467 = vmatprep.subr.bf16.mxu0 %v4227_v21  ;;  %4012 = vmatprep.subr.bf16.mxu1 %v4549_v22  ;;  %v4781_v21 = vld [vmem:[%s4540_s11 + $0x138] ss:$12 sps:$4 sm:$0xff]  }
  0x2d   : > { %3468 = vmatpush3.bf16.msra.mxu0 %v4229_v25  ;;  %4020 = vmatpush3.bf16.msra.mxu1 %v4549_v22  ;;  %v4801_v25 = vld [vmem:[%s4540_s11 + $0x168] ss:$12 sps:$4 sm:$0xff]  }
  0x2e   : > { %3861 = vmatprep.subr.bf16.mxu0 %v4450_v1  ;;  %3589 = vmatprep.subr.bf16.mxu1 %v4235_v26  ;;  %v4804_v26 = vld [vmem:[%s4540_s11 + $0x184] ss:$12 sps:$4 sm:$0xff]  }
  0x30   : > { %909 = vmatmul.mubr.bf16.vlgmr.msra.gmra.mrb[0].mxu0 %v4566_v27  ;;  %3894 = vmatmul.mubr.bf16.vlgmr.msra.gmra.mrb[0].mxu1 %v4234_v28  ;;  %v4311_v28 = vld [vmem:[%s4540_s11 + $0x20] ss:$12 sps:$4 sm:$0xff]  }
  0x31   : > { %3862 = vmatpush3.bf16.msra.mxu0 %v4450_v1  ;;  %3590 = vmatpush3.bf16.msra.mxu1 %v4236_v29  ;;  %v4690_v1 = vld [vmem:[%s4540_s11 + $0xac] ss:$12 sps:$4 sm:$0xff]  }
  0x32   : > { %3591 = vmatprep.subr.bf16.mxu1 %v4237_v30  ;;  %916 = vmatprep.mubr.bf16.mxu0 %v4578_v31  ;;  %v4312_v29 = vld [vmem:[%s4540_s11 + $0x38] ss:$12 sps:$4 sm:$0xff]  }
  0x33   : > { %3897 = vmatprep.mubr.bf16.mxu1 %v4241_v32  ;;  %3863 = vmatprep.subr.bf16.mxu0 %v4463_v4  ;;  %v4314_v30 = vld [vmem:[%s5305_s1 + $0x180] sm:$0xff]   ;;  %v4318_v32 = vld [vmem:[%s4540_s11 + $0x50] ss:$12 sps:$4 sm:$0xff]  }
  0x35   : > { %3592 = vmatpush3.bf16.msra.mxu1 %v4238_v33  ;;  %3864 = vmatpush3.bf16.msra.mxu0 %v4463_v4  ;;  %v4300_v4 = vld [vmem:[%s5305_s1 + $0xa0] sm:$0xff]   ;;  %v4316_v33 = vld [vmem:[%s5305_s1 + $0x1c8] sm:$0xff]  }
  0x36   : > { %3593 = vmatprep.subr.bf16.mxu1 %v4244_v35  ;;  %3865 = vmatprep.subr.bf16.mxu0 %v4475_v7  ;;  %v4317_v35 = vld [vmem:[%s5305_s1 + $0x188] sm:$0xff]  }
  0x38   : > { %917 = vmatmul.mubr.bf16.gmra.mrb[4].mxu0 %v4588_v34  ;;  %3898 = vmatmul.mubr.bf16.gmra.mrb[4].mxu1 %v4243_v36  ;;  %v4320_v36 = vld [vmem:[%s5305_s1 + $0x1d0] sm:$0xff]  }
  0x39   : > { %3594 = vmatpush3.bf16.msra.mxu1 %v4245_v37  ;;  %924 = vmatprep.mubr.bf16.mxu0 %v4602_v39  ;;  %v4319_v37 = vld [vmem:[%s4540_s11 + $0x68] ss:$12 sps:$4 sm:$0xff]  }
  0x3a   : > { %3595 = vmatprep.subr.bf16.mxu1 %v4246_v38  ;;  %3901 = vmatprep.mubr.bf16.mxu1 %v4250_v40  ;;  %v4321_v38 = vld [vmem:[%s5305_s1 + $0x190] sm:$0xff]   ;;  %v4324_v40 = vld [vmem:[%s4540_s11 + $0x80] ss:$12 sps:$4 sm:$0xff]  }
  0x3b   : > { %3866 = vmatpush3.bf16.msra.mxu0 %v4475_v7  ;;  %v4307_v7 = vld [vmem:[%s5305_s1 + $0xa8] sm:$0xff]  }
  0x3c   : > { %3867 = vmatprep.subr.bf16.mxu0 %v4488_v10 }
  0x3d   : > { %3596 = vmatpush3.bf16.msra.mxu1 %v4247_v41  ;;  %v4322_v41 = vld [vmem:[%s5305_s1 + $0x1d8] sm:$0xff]  }
  0x3e   : > { %3597 = vmatprep.subr.bf16.mxu1 %v4253_v44  ;;  %v4326_v44 = vld [vmem:[%s5305_s1 + $0x1e0] sm:$0xff]  }
  0x3f   : > { %3868 = vmatpush3.bf16.msra.mxu0 %v4488_v10  ;;  %v4725_v10 = vld [vmem:[%s4540_s11 + $0xdc] ss:$12 sps:$4 sm:$0xff]  }
  0x40   : > { %925 = vmatmul.mubr.bf16.gmra.mrb[8].mxu0 %v4613_v42  ;;  %3902 = vmatmul.mubr.bf16.gmra.mrb[8].mxu1 %v4252_v43  ;;  %v4323_v43 = vld [vmem:[%s5305_s1 + $0x198] sm:$0xff]  }
  0x41   : > { %3598 = vmatpush3.bf16.msra.mxu1 %v4254_v45  ;;  %932 = vmatprep.mubr.bf16.mxu0 %v4628_v47  ;;  %v4325_v45 = vld [vmem:[%s4540_s11 + $0x98] ss:$12 sps:$4 sm:$0xff]  }
  0x42   : > { %3599 = vmatprep.subr.bf16.mxu1 %v4255_v46  ;;  %3905 = vmatprep.mubr.bf16.mxu1 %v4259_v48  ;;  %v4327_v46 = vld [vmem:[%s5305_s1 + $0x1a0] sm:$0xff]   ;;  %v4331_v48 = vld [vmem:[%s4540_s11 + $0xb0] ss:$12 sps:$4 sm:$0xff]  }
  0x43   : > { %3869 = vmatprep.subr.bf16.mxu0 %v4502_v13 }
  0x44   : > { %3870 = vmatpush3.bf16.msra.mxu0 %v4502_v13  ;;  %v4738_v13 = vld [vmem:[%s4540_s11 + $0xf4] ss:$12 sps:$4 sm:$0xff]  }
  0x45   : > { %3600 = vmatpush3.bf16.msra.mxu1 %v4256_v49  ;;  %3871 = vmatprep.subr.bf16.mxu0 %v4518_v16  ;;  %v4329_v49 = vld [vmem:[%s5305_s1 + $0x1e8] sm:$0xff]  }
  0x46   : > { %3601 = vmatprep.subr.bf16.mxu1 %v4262_v50  ;;  %v4330_v50 = vld [vmem:[%s5305_s1 + $0x1a8] sm:$0xff]  }
  0x48   : > { %933 = vmatmul.mubr.bf16.gmra.mrb[12].mxu0 %v4641_v51  ;;  %3906 = vmatmul.mubr.bf16.gmra.mrb[12].mxu1 %v4261_v52  ;;  %v4333_v52 = vld [vmem:[%s5305_s1 + $0x1f0] sm:$0xff]  }
  0x49   : > { %3602 = vmatpush3.bf16.msra.mxu1 %v4263_v53  ;;  %940 = vmatprep.mubr.bf16.mxu0 %v4653_v55  ;;  %v4332_v53 = vld [vmem:[%s4540_s11 + $0xc8] ss:$12 sps:$4 sm:$0xff]  }
  0x4a   : > { %3603 = vmatprep.subr.bf16.mxu1 %v4264_v54  ;;  %1630 = vmatprep.mubr.bf16.mxu1 %v4270_v56  ;;  %v4334_v54 = vld [vmem:[%s5305_s1 + $0x1b0] sm:$0xff]  }
  0x4b   : > { %3872 = vmatpush3.bf16.msra.mxu0 %v4518_v16  ;;  %v4753_v16 = vld [vmem:[%s5305_s1 + $0x200] sm:$0xff]   ;;  %v4337_v56 = vld [vmem:[%s4540_s11 + $0x8] ss:$12 sps:$4 sm:$0xff]  }
  0x4c   : > { %3873 = vmatprep.subr.bf16.mxu0 %v4532_v19 }
  0x4d   : > { %3604 = vmatpush3.bf16.msra.mxu1 %v4265_v57  ;;  %v4335_v57 = vld [vmem:[%s5305_s1 + $0x1f8] sm:$0xff]  }
  0x4e   : > { %3909 = vmatprep.subr.bf16.mxu1 %v4272_v58 }
  0x4f   : > { %3874 = vmatpush3.bf16.msra.mxu0 %v4532_v19  ;;  %v4771_v19 = vld [vmem:[%s4540_s11 + $0x120] ss:$12 sps:$4 sm:$0xff]  }
  0x50   : > { %941 = vmatmul.mubr.bf16.gmra.mrb[16].mxu0 %v4668_v60  ;;  %1631 = vmatmul.mubr.bf16.vlgmr.msra.gmra.mrb[16].mxu1 %v4268_v59  ;;  %v4338_v59 = vld [vmem:[%s4540_s11 + $0x20] ss:$12 sps:$4 sm:$0xff]  }
  0x51   : > { %3910 = vmatpush3.bf16.msra.mxu1 %v4272_v58  ;;  %948 = vmatprep.mubr.bf16.mxu0 %v4672_v61  ;;  %v4336_v58 = vld [vmem:[%s5305_s1 + $0x1b8] sm:$0xff]  }
  0x52   : > { %1638 = vmatprep.mubr.bf16.mxu1 %v4553_v23  ;;  %3911 = vmatprep.subr.bf16.mxu1 %v4279_v62  ;;  %v4791_v23 = vld [vmem:[%s4540_s11 + $0x150] ss:$12 sps:$4 sm:$0xff]  }
  0x53   : > { %3875 = vmatprep.subr.bf16.mxu0 %v4549_v22 }
  0x54   : > { %3876 = vmatpush3.bf16.msra.mxu0 %v4549_v22  ;;  %v4784_v22 = vld [vmem:[%s4540_s11 + $0x154] ss:$12 sps:$4 sm:$0xff]  }
  0x55   : > { %3912 = vmatpush3.bf16.msra.mxu1 %v4279_v62  ;;  %3725 = vmatprep.subr.bf16.mxu0 %v4313_v5  ;;  %v4340_v62 = vld [vmem:[%s4540_s11 + $0x38] ss:$12 sps:$4 sm:$0xff]   ;;  %v4344_v5 = vld [vmem:[%s4540_s11 + $0x80] ss:$12 sps:$4 sm:$0xff]  }
  0x56   : > { %3913 = vmatprep.subr.bf16.mxu1 %v4286_v63 }
  0x58   : > { %949 = vmatmul.mubr.bf16.gmra.mrb[20].mxu0 %v4686_v0  ;;  %1639 = vmatmul.mubr.bf16.gmra.mrb[20].mxu1 %v4566_v27  ;;  %v4811_v27 = vld [vmem:[%s4540_s11 + $0x180] ss:$12 sps:$4 sm:$0xff]  }
  0x59   : > { %956 = vmatprep.mubr.bf16.mxu0 %v4690_v1  ;;  %1646 = vmatprep.mubr.bf16.mxu1 %v4578_v31 }
  0x5a   : > { %3914 = vmatpush3.bf16.msra.mxu1 %v4286_v63  ;;  %v4342_v63 = vld [vmem:[%s5305_s1 + $0x208] sm:$0xff]  }
  0x5b   : > { %3915 = vmatprep.subr.bf16.mxu1 %v4293_v2 }
  0x5e   : > { %3916 = vmatpush3.bf16.msra.mxu1 %v4293_v2  ;;  %v4341_v2 = vld [vmem:[%s4540_s11 + $0x50] ss:$12 sps:$4 sm:$0xff]  }
  0x5f   : > { %3917 = vmatprep.subr.bf16.mxu1 %v4300_v4 }
  0x60   : > { %957 = vmatmul.mubr.bf16.gmra.mrb[24].mxu0 %v4700_v3  ;;  %1647 = vmatmul.mubr.bf16.gmra.mrb[24].mxu1 %v4588_v34 }
  0x61   : > { %964 = vmatprep.mubr.bf16.mxu0 %v4709_v6  ;;  %1654 = vmatprep.mubr.bf16.mxu1 %v4602_v39 }
  0x62   : > { %3918 = vmatpush3.bf16.msra.mxu1 %v4300_v4  ;;  %v4343_v4 = vld [vmem:[%s4540_s11 + $0x68] ss:$12 sps:$4 sm:$0xff]  }
  0x63   : > { %3919 = vmatprep.subr.bf16.mxu1 %v4307_v7 }
  0x66   : > { %3920 = vmatpush3.bf16.msra.mxu1 %v4307_v7  ;;  %v4346_v7 = vld [vmem:[%s4540_s11 + $0x98] ss:$12 sps:$4 sm:$0xff]  }
  0x67   : > { %3921 = vmatprep.subr.bf16.mxu1 %v4315_v8 }
  0x68   : > { %965 = vmatmul.mubr.bf16.gmra.mrb[28].mxu0 %v4722_v9  ;;  %1655 = vmatmul.mubr.bf16.gmra.mrb[28].mxu1 %v4613_v42 }
  0x69   : > { %972 = vmatprep.mubr.bf16.mxu0 %v4725_v10  ;;  %1662 = vmatprep.mubr.bf16.mxu1 %v4628_v47 }
  0x6a   : > { %3922 = vmatpush3.bf16.msra.mxu1 %v4315_v8  ;;  %v4354_v8 = vld [vmem:[%s5305_s1 + $0x228] sm:$0xff]  }
  0x6b   : > { %3923 = vmatprep.subr.bf16.mxu1 %v4328_v11 }
  0x6e   : > { %3924 = vmatpush3.bf16.msra.mxu1 %v4328_v11  ;;  %v4349_v11 = vld [vmem:[%s4540_s11 + $0xc8] ss:$12 sps:$4 sm:$0xff]  }
  0x6f   : > { %3957 = vmatprep.subr.bf16.mxu1 %v4753_v16 }
  0x70   : > { %973 = vmatmul.mubr.bf16.gmra.mrb[32].mxu0 %v4735_v12  ;;  %1663 = vmatmul.mubr.bf16.gmra.mrb[32].mxu1 %v4641_v51 }
  0x71   : > { %980 = vmatprep.mubr.bf16.mxu0 %v4738_v13  ;;  %1670 = vmatprep.mubr.bf16.mxu1 %v4653_v55 }
  0x78   : > { %981 = vmatmul.mubr.bf16.gmra.mrb[36].mxu0 %v4745_v14  ;;  %1671 = vmatmul.mubr.bf16.gmra.mrb[36].mxu1 %v4668_v60 }
  0x79   : > { %988 = vmatprep.mubr.bf16.mxu0 %v4748_v15  ;;  %1678 = vmatprep.mubr.bf16.mxu1 %v4672_v61 }
  0x80   : > { %989 = vmatmul.mubr.bf16.gmra.mrb[40].mxu0 %v4761_v17  ;;  %1679 = vmatmul.mubr.bf16.gmra.mrb[40].mxu1 %v4686_v0 }
  0x81   : > { %996 = vmatprep.mubr.bf16.mxu0 %v4764_v18  ;;  %1686 = vmatprep.mubr.bf16.mxu1 %v4690_v1 }
  0x88   : > { %997 = vmatmul.mubr.bf16.gmra.mrb[44].mxu0 %v4771_v19  ;;  %1687 = vmatmul.mubr.bf16.gmra.mrb[44].mxu1 %v4700_v3 }
  0x89   : > { %1004 = vmatprep.mubr.bf16.mxu0 %v4774_v20  ;;  %1694 = vmatprep.mubr.bf16.mxu1 %v4709_v6 }
  0x90   : > { %1005 = vmatmul.mubr.bf16.gmra.mrb[48].mxu0 %v4781_v21  ;;  %1695 = vmatmul.mubr.bf16.gmra.mrb[48].mxu1 %v4722_v9 }
  0x91   : > { %1012 = vmatprep.mubr.bf16.mxu0 %v4784_v22  ;;  %1702 = vmatprep.mubr.bf16.mxu1 %v4725_v10 }
  0x98   : > { %1013 = vmatmul.mubr.bf16.gmra.mrb[52].mxu0 %v4791_v23  ;;  %1703 = vmatmul.mubr.bf16.gmra.mrb[52].mxu1 %v4735_v12 }
  0x99   : > { %1020 = vmatprep.mubr.bf16.mxu0 %v4794_v24  ;;  %1710 = vmatprep.mubr.bf16.mxu1 %v4738_v13 }
  0xa0   : > { %1021 = vmatmul.mubr.bf16.gmra.mrb[56].mxu0 %v4801_v25  ;;  %1711 = vmatmul.mubr.bf16.gmra.mrb[56].mxu1 %v4745_v14 }
  0xa1   : > { %1028 = vmatprep.mubr.bf16.mxu0 %v4804_v26  ;;  %1718 = vmatprep.mubr.bf16.mxu1 %v4748_v15 }
  0xa8   : > { %1029 = vmatmul.mubr.bf16.gmra.mrb[60].mxu0 %v4811_v27  ;;  %1719 = vmatmul.mubr.bf16.gmra.mrb[60].mxu1 %v4761_v17 }
  0xa9   : > { %3877 = vmatprep.mubr.bf16.mxu0 %v4311_v28  ;;  %1726 = vmatprep.mubr.bf16.mxu1 %v4764_v18  ;;  %v4353_v28 = vld [vmem:[%s4540_s11 + $0x110] ss:$12 sps:$4 sm:$0xff]  }
  0xb0   : > { %3878 = vmatmul.mubr.bf16.vlgmr.msra.gmra.mrb[64].mxu0 %v4312_v29  ;;  %1727 = vmatmul.mubr.bf16.gmra.mrb[64].mxu1 %v4771_v19  ;;  %v4355_v29 = vld [vmem:[%s4540_s11 + $0x128] ss:$12 sps:$4 sm:$0xff]  }
  0xb1   : > { %3726 = vmatpush3.bf16.msra.mxu0 %v4314_v30  ;;  %3881 = vmatprep.mubr.bf16.mxu0 %v4318_v32  ;;  %v4359_v30 = vld [vmem:[%s4540_s11 + $0x170] ss:$12 sps:$4 sm:$0xff]  }
  0xb2   : > { %3727 = vmatprep.subr.bf16.mxu0 %v4316_v33  ;;  %1734 = vmatprep.mubr.bf16.mxu1 %v4774_v20 }
  0xb5   : > { %3728 = vmatpush3.bf16.msra.mxu0 %v4317_v35 }
  0xb6   : > { %3729 = vmatprep.subr.bf16.mxu0 %v4320_v36 }
  0xb8   : > { %3882 = vmatmul.mubr.bf16.gmra.mrb[68].mxu0 %v4319_v37  ;;  %1735 = vmatmul.mubr.bf16.gmra.mrb[68].mxu1 %v4781_v21 }
  0xb9   : > { %3730 = vmatpush3.bf16.msra.mxu0 %v4321_v38  ;;  %3885 = vmatprep.mubr.bf16.mxu0 %v4324_v40  ;;  %v4363_v40 = vld [vmem:[%s4540_s11 + $0x68] ss:$12 sps:$4 sm:$0xff]  }
  0xba   : > { %3731 = vmatprep.subr.bf16.mxu0 %v4322_v41  ;;  %1742 = vmatprep.mubr.bf16.mxu1 %v4784_v22 }
  0xbd   : > { %3732 = vmatpush3.bf16.msra.mxu0 %v4323_v43 }
  0xbe   : > { %3733 = vmatprep.subr.bf16.mxu0 %v4326_v44  ;;  %v4364_v44 = vld [vmem:[%s4540_s11 + $0x80] ss:$12 sps:$4 sm:$0xff]  }
  0xc0   : > { %3886 = vmatmul.mubr.bf16.gmra.mrb[72].mxu0 %v4325_v45  ;;  %1743 = vmatmul.mubr.bf16.gmra.mrb[72].mxu1 %v4791_v23 }
  0xc1   : > { %3734 = vmatpush3.bf16.msra.mxu0 %v4327_v46  ;;  %3889 = vmatprep.mubr.bf16.mxu0 %v4331_v48  ;;  %v4365_v48 = vld [vmem:[%s4540_s11 + $0x98] ss:$12 sps:$4 sm:$0xff]  }
  0xc2   : > { %3735 = vmatprep.subr.bf16.mxu0 %v4329_v49  ;;  %1750 = vmatprep.mubr.bf16.mxu1 %v4794_v24 }
  0xc5   : > { %3736 = vmatpush3.bf16.msra.mxu0 %v4330_v50 }
  0xc6   : > { %3737 = vmatprep.subr.bf16.mxu0 %v4333_v52  ;;  %v4366_v52 = vld [vmem:[%s4540_s11 + $0xb0] ss:$12 sps:$4 sm:$0xff]  }
  0xc8   : > { %3890 = vmatmul.mubr.bf16.gmra.mrb[76].mxu0 %v4332_v53  ;;  %1751 = vmatmul.mubr.bf16.gmra.mrb[76].mxu1 %v4801_v25 }
  0xc9   : > { %3738 = vmatpush3.bf16.msra.mxu0 %v4334_v54  ;;  %3925 = vmatprep.mubr.bf16.mxu1 %v4337_v56  ;;  %v4367_v56 = vld [vmem:[%s4540_s11 + $0xc8] ss:$12 sps:$4 sm:$0xff]  }
  0xca   : > { %3739 = vmatprep.subr.bf16.mxu0 %v4335_v57  ;;  %2469 = vmatprep.mubr.bf16.mxu0 %v4578_v31  ;;  %v4345_v31 = vld [vmem:[%s5305_s1 + $0x210] sm:$0xff]  }
  0xcd   : > { %3740 = vmatpush3.bf16.msra.mxu0 %v4336_v58 }
  0xd0   : > { %3926 = vmatmul.mubr.bf16.vlgmr.msra.gmra.mrb[80].mxu1 %v4338_v59  ;;  %2470 = vmatmul.mubr.bf16.vlgmr.msra.gmra.mrb[80].mxu0 %v4588_v34  ;;  %v4348_v34 = vld [vmem:[%s5305_s1 + $0x218] sm:$0xff]  }
  0xd1   : > { %3958 = vmatpush3.bf16.msra.mxu1 %v4753_v16  ;;  %3929 = vmatprep.mubr.bf16.mxu1 %v4340_v62  ;;  %v4352_v16 = vld [vmem:[%s4540_s11 + $0xf8] ss:$12 sps:$4 sm:$0xff]  }
  0xd2   : > { %2477 = vmatprep.mubr.bf16.mxu0 %v4602_v39  ;;  %3959 = vmatprep.subr.bf16.mxu1 %v4342_v63  ;;  %v4351_v39 = vld [vmem:[%s5305_s1 + $0x220] sm:$0xff]  }
  0xd5   : > { %3960 = vmatpush3.bf16.msra.mxu1 %v4342_v63  ;;  %v4368_v63 = vld [vmem:[%s4540_s11 + $0xe0] ss:$12 sps:$4 sm:$0xff]  }
  0xd6   : > { %3961 = vmatprep.subr.bf16.mxu1 %v4345_v31 }
  0xd8   : > { %3930 = vmatmul.mubr.bf16.gmra.mrb[84].mxu1 %v4341_v2  ;;  %2478 = vmatmul.mubr.bf16.gmra.mrb[84].mxu0 %v4613_v42  ;;  %v4357_v42 = vld [vmem:[%s5305_s1 + $0x230] sm:$0xff]  }
  0xd9   : > { %3933 = vmatprep.mubr.bf16.mxu1 %v4343_v4  ;;  %2485 = vmatprep.mubr.bf16.mxu0 %v4628_v47  ;;  %v4347_v47 = vld [vmem:[%s4540_s11 + $0xb0] ss:$12 sps:$4 sm:$0xff]  }
  0xda   : > { %3962 = vmatpush3.bf16.msra.mxu1 %v4345_v31 }
  0xdb   : > { %3963 = vmatprep.subr.bf16.mxu1 %v4348_v34 }
  0xde   : > { %3964 = vmatpush3.bf16.msra.mxu1 %v4348_v34 }
  0xdf   : > { %3965 = vmatprep.subr.bf16.mxu1 %v4351_v39 }
  0xe0   : > { %3934 = vmatmul.mubr.bf16.gmra.mrb[88].mxu1 %v4344_v5  ;;  %2486 = vmatmul.mubr.bf16.gmra.mrb[88].mxu0 %v4641_v51  ;;  %v4360_v51 = vld [vmem:[%s5305_s1 + $0x238] sm:$0xff]  }
  0xe1   : > { %3937 = vmatprep.mubr.bf16.mxu1 %v4346_v7  ;;  %2493 = vmatprep.mubr.bf16.mxu0 %v4653_v55  ;;  %v4350_v55 = vld [vmem:[%s4540_s11 + $0xe0] ss:$12 sps:$4 sm:$0xff]  }
  0xe2   : > { %3966 = vmatpush3.bf16.msra.mxu1 %v4351_v39  ;;  %v4369_v39 = vld [vmem:[%s4540_s11 + $0xf8] ss:$12 sps:$4 sm:$0xff]  }
  0xe3   : > { %3967 = vmatprep.subr.bf16.mxu1 %v4354_v8 }
  0xe6   : > { %3968 = vmatpush3.bf16.msra.mxu1 %v4354_v8 }
  0xe7   : > { %3969 = vmatprep.subr.bf16.mxu1 %v4357_v42 }
  0xe8   : > { %3938 = vmatmul.mubr.bf16.gmra.mrb[92].mxu1 %v4347_v47  ;;  %2494 = vmatmul.mubr.bf16.gmra.mrb[92].mxu0 %v4668_v60  ;;  %v4356_v60 = vld [vmem:[%s4540_s11 + $0x140] ss:$12 sps:$4 sm:$0xff]  }
  0xe9   : > { %3941 = vmatprep.mubr.bf16.mxu1 %v4349_v11  ;;  %2501 = vmatprep.mubr.bf16.mxu0 %v4672_v61  ;;  %v4358_v61 = vld [vmem:[%s4540_s11 + $0x158] ss:$12 sps:$4 sm:$0xff]  }
  0xea   : > { %3970 = vmatpush3.bf16.msra.mxu1 %v4357_v42 }
  0xeb   : > { %3971 = vmatprep.subr.bf16.mxu1 %v4360_v51 }
  0xee   : > { %3972 = vmatpush3.bf16.msra.mxu1 %v4360_v51  ;;  %v4370_v51 = vld [vmem:[%s4540_s11 + $0x110] ss:$12 sps:$4 sm:$0xff]  }
  0xf0   : > { %3942 = vmatmul.mubr.bf16.gmra.mrb[0].mxu1 %v4350_v55  ;;  %2502 = vmatmul.mubr.bf16.gmra.mrb[96].mxu0 %v4686_v0 }
  0xf1   : > { %3945 = vmatprep.mubr.bf16.mxu1 %v4352_v16  ;;  %2509 = vmatprep.mubr.bf16.mxu0 %v4690_v1 }
  0xf8   : > { %3946 = vmatmul.mubr.bf16.gmra.mrb[4].mxu1 %v4353_v28  ;;  %2510 = vmatmul.mubr.bf16.gmra.mrb[100].mxu0 %v4700_v3  ;;  %v4361_v3 = vld [vmem:[%s4540_s11 + $0x38] ss:$12 sps:$4 sm:$0xff]  }
  0xf9   : > { %3949 = vmatprep.mubr.bf16.mxu1 %v4355_v29  ;;  %2517 = vmatprep.mubr.bf16.mxu0 %v4709_v6 }
 0x100   : > { %3950 = vmatmul.mubr.bf16.gmra.mrb[8].mxu1 %v4356_v60  ;;  %2518 = vmatmul.mubr.bf16.gmra.mrb[104].mxu0 %v4722_v9  ;;  %v4371_v60 = vld [vmem:[%s4540_s11 + $0x128] ss:$12 sps:$4 sm:$0xff]  }
 0x101   : > { %3953 = vmatprep.mubr.bf16.mxu1 %v4358_v61  ;;  %2525 = vmatprep.mubr.bf16.mxu0 %v4725_v10  ;;  %v4362_v10 = vld [vmem:[%s4540_s11 + $0x50] ss:$12 sps:$4 sm:$0xff]  }
 0x103   : > { %v3469_v0 = vpop.f32.mrb[0].mxu0 }
 0x104   : > { %v3470_v1 = vpop.f32.mrb[1].mxu0 }
 0x105   : > { %v4929_v32 = vadd.f32 %v3470_v1, %v3469_v0  ;;  %v3472_v33 = vpop.f32.mrb[2].mxu0 }
 0x106   : > { %v3473_v35 = vpop.f32.mrb[3].mxu0 }
 0x107   : > { %v4932_v36 = vadd.f32 %v3473_v35, %v3472_v33  ;;  %v4372_v35 = vld [vmem:[%s4540_s11 + $0x140] ss:$12 sps:$4 sm:$0xff]  }
 0x108   : > { %3954 = vmatmul.mubr.bf16.gmra.mrb[12].mxu1 %v4359_v30  ;;  %2526 = vmatmul.mubr.bf16.gmra.mrb[108].mxu0 %v4735_v12 }
 0x109   : > { %2533 = vmatprep.mubr.bf16.mxu0 %v4738_v13  ;;  %3973 = vmatprep.mubr.bf16.mxu1 %v4361_v3 }
 0x10b   : > { %v3475_v6 = vpop.f32.mrb[4].mxu0 }
 0x10c   : > { %v3476_v9 = vpop.f32.mrb[5].mxu0 }
 0x10d   : > { %v4937_v37 = vadd.f32 %v3476_v9, %v3475_v6  ;;  %v3478_v38 = vpop.f32.mrb[6].mxu0 }
 0x10e   : > { %v3479_v41 = vpop.f32.mrb[7].mxu0 }
 0x10f   : > { %v4940_v43 = vadd.f32 %v3479_v41, %v3478_v38 }
 0x110   : > { %2534 = vmatmul.mubr.bf16.gmra.mrb[112].mxu0 %v4745_v14  ;;  %3974 = vmatmul.mubr.bf16.vlgmr.msra.gmra.mrb[80].mxu1 %v4362_v10 }
 0x111   : > { %2541 = vmatprep.mubr.bf16.mxu0 %v4748_v15  ;;  %3977 = vmatprep.mubr.bf16.mxu1 %v4363_v40  ;;  %v4373_v40 = vld [vmem:[%s4540_s11 + $0x158] ss:$12 sps:$4 sm:$0xff]  }
 0x113   : > { %v3481_v12 = vpop.f32.mrb[8].mxu0 }
 0x114   : > { %v3482_v13 = vpop.f32.mrb[9].mxu0 }
 0x115   : > { %v4945_v45 = vadd.f32 %v3482_v13, %v3481_v12  ;;  %v3484_v46 = vpop.f32.mrb[10].mxu0 }
 0x116   : > { %v3485_v49 = vpop.f32.mrb[11].mxu0 }
 0x117   : > { %v4948_v50 = vadd.f32 %v3485_v49, %v3484_v46  ;;  %v4374_v49 = vld [vmem:[%s4540_s11 + $0x170] ss:$12 sps:$4 sm:$0xff]  }
 0x118   : > { %2542 = vmatmul.mubr.bf16.gmra.mrb[116].mxu0 %v4761_v17  ;;  %3978 = vmatmul.mubr.bf16.gmra.mrb[84].mxu1 %v4364_v44 }
 0x119   : > { %2549 = vmatprep.mubr.bf16.mxu0 %v4764_v18  ;;  %3981 = vmatprep.mubr.bf16.mxu1 %v4365_v48 }
 0x11b   : > { %v3487_v14 = vpop.f32.mrb[12].mxu0 }
 0x11c   : > { %v3488_v15 = vpop.f32.mrb[13].mxu0 }
 0x11d   : > { %v4953_v53 = vadd.f32 %v3488_v15, %v3487_v14  ;;  %v3490_v54 = vpop.f32.mrb[14].mxu0 }
 0x11e   : > { %v3491_v57 = vpop.f32.mrb[15].mxu0 }
 0x11f   : > { %v4956_v58 = vadd.f32 %v3491_v57, %v3490_v54  ;;  %v4377_v57 = vld [vmem:[%s4540_s11 + $0x188] ss:$12 sps:$4 sm:$0xff]  }
 0x120   : > { %2550 = vmatmul.mubr.bf16.gmra.mrb[120].mxu0 %v4771_v19  ;;  %3982 = vmatmul.mubr.bf16.gmra.mrb[88].mxu1 %v4366_v52 }
 0x121   : > { %2557 = vmatprep.mubr.bf16.mxu0 %v4774_v20  ;;  %3985 = vmatprep.mubr.bf16.mxu1 %v4367_v56  ;;  %v4375_v56 = vld [vmem:[%s4540_s11 + $0x19c] ss:$12 sps:$4 sm:$0xff]  }
 0x123   : > { %v3493_v17 = vpop.f32.mrb[16].mxu0  ;;  %v3605_v18 = vpop.f32.mrb[16].mxu1 }
 0x124   : > { %v3494_v59 = vpop.f32.mrb[17].mxu0  ;;  %v3606_v62 = vpop.f32.mrb[17].mxu1 }
 0x125   : > { %v4961_v31 = vadd.f32 %v3494_v59, %v3493_v17  ;;  %v3496_v2 = vpop.f32.mrb[18].mxu0  ;;  %v4963_v4 = vadd.f32 %v3606_v62, %v3605_v18  ;;  %v3608_v34 = vpop.f32.mrb[18].mxu1 }
 0x126   : > { %v3497_v5 = vpop.f32.mrb[19].mxu0  ;;  %v3609_v7 = vpop.f32.mrb[19].mxu1 }
 0x127   : > { %v4966_v19 = vadd.f32 %v3497_v5, %v3496_v2  ;;  %v4968_v20 = vadd.f32 %v3609_v7, %v3608_v34  ;;  %v4378_v34 = vld [vmem:[%s4540_s11 + $0x198] ss:$12 sps:$4 sm:$0xff]  }
 0x128   : > { %2558 = vmatmul.mubr.bf16.gmra.mrb[124].mxu0 %v4781_v21  ;;  %3986 = vmatmul.mubr.bf16.gmra.mrb[92].mxu1 %v4368_v63 }
 0x129   : > { %2565 = vmatprep.mubr.bf16.mxu0 %v4784_v22  ;;  %3989 = vmatprep.mubr.bf16.mxu1 %v4369_v39  ;;  %v4379_v39 = vld [vmem:[%s4540_s11 + $0x1a0] ss:$12 sps:$4 sm:$0xff]   ;;  %s3452_s11 = sshll.u32 %s5317_s12, 8 }
 0x12a   : > { %s5190_s7 = scalar_lea.vmem %s5307_s3, %s3452_s11 }
 0x12b   : > { %v3499_v8 = vpop.f32.mrb[20].mxu0  ;;  %v3611_v42 = vpop.f32.mrb[20].mxu1 }
 0x12c   : > { %v3500_v47 = vpop.f32.mrb[21].mxu0  ;;  %v3612_v11 = vpop.f32.mrb[21].mxu1 }
 0x12d   : > { %v4973_v55 = vadd.f32 %v3500_v47, %v3499_v8  ;;  %v3502_v16 = vpop.f32.mrb[22].mxu0  ;;  %v4975_v28 = vadd.f32 %v3612_v11, %v3611_v42  ;;  %v3614_v29 = vpop.f32.mrb[22].mxu1 }
 0x12e   : > { %v3503_v61 = vpop.f32.mrb[23].mxu0  ;;  %v3615_v0 = vpop.f32.mrb[23].mxu1 }
 0x12f   : > { %v4978_v21 = vadd.f32 %v3503_v61, %v3502_v16  ;;  %v4980_v22 = vadd.f32 %v3615_v0, %v3614_v29 }
 0x130   : > { %2566 = vmatmul.mubr.bf16.gmra.mrb[128].mxu0 %v4791_v23  ;;  %3990 = vmatmul.mubr.bf16.gmra.mrb[0].mxu1 %v4370_v51 }
 0x131   : > { %2573 = vmatprep.mubr.bf16.mxu0 %v4794_v24  ;;  %3993 = vmatprep.mubr.bf16.mxu1 %v4371_v60 }
 0x133   : > { %v3505_v1 = vpop.f32.mrb[24].mxu0  ;;  %v3617_v30 = vpop.f32.mrb[24].mxu1 }
 0x134   : > { %v3506_v33 = vpop.f32.mrb[25].mxu0  ;;  %v3618_v3 = vpop.f32.mrb[25].mxu1 }
 0x135   : > { %v4985_v6 = vadd.f32 %v3506_v33, %v3505_v1  ;;  %v3508_v9 = vpop.f32.mrb[26].mxu0  ;;  %v4987_v10 = vadd.f32 %v3618_v3, %v3617_v30  ;;  %v3620_v38 = vpop.f32.mrb[26].mxu1 }
 0x136   : > { %v3509_v41 = vpop.f32.mrb[27].mxu0  ;;  %v3621_v12 = vpop.f32.mrb[27].mxu1 }
 0x137   : > { %v4990_v23 = vadd.f32 %v3509_v41, %v3508_v9  ;;  %v4992_v24 = vadd.f32 %v3621_v12, %v3620_v38 }
 0x138   : > { %2574 = vmatmul.mubr.bf16.gmra.mrb[132].mxu0 %v4801_v25  ;;  %3994 = vmatmul.mubr.bf16.gmra.mrb[4].mxu1 %v4372_v35 }
 0x139   : > { %2581 = vmatprep.mubr.bf16.mxu0 %v4804_v26  ;;  %3997 = vmatprep.mubr.bf16.mxu1 %v4373_v40 }
 0x13b   : > { %v3511_v13 = vpop.f32.mrb[28].mxu0  ;;  %v3623_v44 = vpop.f32.mrb[28].mxu1 }
 0x13c   : > { %v3512_v46 = vpop.f32.mrb[29].mxu0  ;;  %v3624_v48 = vpop.f32.mrb[29].mxu1 }
 0x13d   : > { %v4997_v14 = vadd.f32 %v3512_v46, %v3511_v13  ;;  %v3514_v15 = vpop.f32.mrb[30].mxu0  ;;  %v4999_v52 = vadd.f32 %v3624_v48, %v3623_v44  ;;  %v3626_v54 = vpop.f32.mrb[30].mxu1 }
 0x13e   : > { %v3515_v25 = vpop.f32.mrb[31].mxu0  ;;  %v3627_v17 = vpop.f32.mrb[31].mxu1 }
 0x13f   : > { %v5003_v18 = vadd.f32 %v3515_v25, %v3514_v15  ;;  %v5005_v26 = vadd.f32 %v3627_v17, %v3626_v54 }
 0x140   : > { %2582 = vmatmul.mubr.bf16.gmra.mrb[136].mxu0 %v4811_v27  ;;  %3998 = vmatmul.mubr.bf16.gmra.mrb[8].mxu1 %v4374_v49 }
 0x141   : > { %2589 = vmatprep.mubr.bf16.mxu0 %v4375_v56  ;;  %4001 = vmatprep.mubr.bf16.mxu1 %v4377_v57 }
 0x143   : > { %v3517_v59 = vpop.f32.mrb[32].mxu0  ;;  %v3629_v62 = vpop.f32.mrb[32].mxu1 }
 0x144   : > { %v3518_v63 = vpop.f32.mrb[33].mxu0  ;;  %v3630_v2 = vpop.f32.mrb[33].mxu1 }
 0x145   : > { %v3519_v5 = vadd.f32 %v3518_v63, %v3517_v59  ;;  %v3520_v7 = vpop.f32.mrb[34].mxu0  ;;  %v5010_v8 = vadd.f32 %v3630_v2, %v3629_v62  ;;  %v3632_v42 = vpop.f32.mrb[34].mxu1 }
 0x146   : > { %v3521_v47 = vpop.f32.mrb[35].mxu0  ;;  %v3633_v11 = vpop.f32.mrb[35].mxu1 }
 0x147   : > { %v3522_v51 = vadd.f32 %v3521_v47, %v3520_v7  ;;  %v5012_v16 = vadd.f32 %v3633_v11, %v3632_v42 }
 0x148   : > { %2590 = vmatmul.mubr.bf16.gmra.mrb[140].mxu0 %v4378_v34  ;;  %4002 = vmatmul.mubr.bf16.gmra.mrb[12].mxu1 %v4379_v39 }
 0x14b   : > { %v3523_v27 = vpop.f32.mrb[36].mxu0  ;;  %v3635_v29 = vpop.f32.mrb[36].mxu1 }
 0x14c   : > { %v3524_v60 = vpop.f32.mrb[37].mxu0  ;;  %v3636_v61 = vpop.f32.mrb[37].mxu1 }
 0x14d   : > { %v3525_v0 = vadd.f32 %v3524_v60, %v3523_v27  ;;  %v3526_v1 = vpop.f32.mrb[38].mxu0  ;;  %v5014_v30 = vadd.f32 %v3636_v61, %v3635_v29  ;;  %v3638_v33 = vpop.f32.mrb[38].mxu1 }
 0x14e   : > { %v3527_v3 = vpop.f32.mrb[39].mxu0  ;;  %v3639_v35 = vpop.f32.mrb[39].mxu1 }
 0x14f   : > { %v3528_v9 = vadd.f32 %v3527_v3, %v3526_v1  ;;  %v5016_v38 = vadd.f32 %v3639_v35, %v3638_v33 }
 0x153   : > { %v3529_v40 = vpop.f32.mrb[40].mxu0  ;;  %v3641_v41 = vpop.f32.mrb[40].mxu1 }
 0x154   : > { %v3530_v12 = vpop.f32.mrb[41].mxu0  ;;  %v3642_v13 = vpop.f32.mrb[41].mxu1 }
 0x155   : > { %v3531_v44 = vadd.f32 %v3530_v12, %v3529_v40  ;;  %v3532_v46 = vpop.f32.mrb[42].mxu0  ;;  %v5018_v48 = vadd.f32 %v3642_v13, %v3641_v41  ;;  %v3644_v49 = vpop.f32.mrb[42].mxu1 }
 0x156   : > { %v3533_v15 = vpop.f32.mrb[43].mxu0  ;;  %v3645_v54 = vpop.f32.mrb[43].mxu1 }
 0x157   : > { %v3534_v56 = vadd.f32 %v3533_v15, %v3532_v46  ;;  %v5020_v57 = vadd.f32 %v3645_v54, %v3644_v49 }
 0x15b   : > { %v3535_v25 = vpop.f32.mrb[44].mxu0  ;;  %v3647_v17 = vpop.f32.mrb[44].mxu1 }
 0x15c   : > { %v3536_v59 = vpop.f32.mrb[45].mxu0  ;;  %v3648_v62 = vpop.f32.mrb[45].mxu1 }
 0x15d   : > { %v3537_v63 = vadd.f32 %v3536_v59, %v3535_v25  ;;  %v3538_v2 = vpop.f32.mrb[46].mxu0  ;;  %v5022_v34 = vadd.f32 %v3648_v62, %v3647_v17  ;;  %v3650_v39 = vpop.f32.mrb[46].mxu1 }
 0x15e   : > { %v3539_v7 = vpop.f32.mrb[47].mxu0  ;;  %v3651_v42 = vpop.f32.mrb[47].mxu1 }
 0x15f   : > { %v3540_v47 = vadd.f32 %v3539_v7, %v3538_v2  ;;  %v5024_v11 = vadd.f32 %v3651_v42, %v3650_v39 }
 0x163   : > { %v3541_v27 = vpop.f32.mrb[48].mxu0  ;;  %v3653_v29 = vpop.f32.mrb[48].mxu1 }
 0x164   : > { %v3542_v60 = vpop.f32.mrb[49].mxu0  ;;  %v3654_v61 = vpop.f32.mrb[49].mxu1 }
 0x165   : > { %v5026_v1 = vadd.f32 %v3542_v60, %v3541_v27  ;;  %v3655_v33 = vadd.f32 %v3654_v61, %v3653_v29  ;;  %v3544_v3 = vpop.f32.mrb[50].mxu0  ;;  %v3656_v35 = vpop.f32.mrb[50].mxu1 }
 0x166   : > { %v3545_v40 = vpop.f32.mrb[51].mxu0  ;;  %v3657_v41 = vpop.f32.mrb[51].mxu1 }
 0x167   : > { %v5028_v12 = vadd.f32 %v3655_v33, %v3519_v5  ;;  %v5030_v13 = vadd.f32 %v3545_v40, %v3544_v3  ;;  %v3658_v46 = vadd.f32 %v3657_v41, %v3656_v35 }
 0x169   : > { %v5032_v49 = vadd.f32 %v3658_v46, %v3522_v51 }
 0x16b   : > { %v3547_v15 = vpop.f32.mrb[52].mxu0  ;;  %v3659_v54 = vpop.f32.mrb[52].mxu1 }
 0x16c   : > { %v3548_v25 = vpop.f32.mrb[53].mxu0  ;;  %v3660_v17 = vpop.f32.mrb[53].mxu1 }
 0x16d   : > { %v5034_v59 = vadd.f32 %v3548_v25, %v3547_v15  ;;  %v3661_v62 = vadd.f32 %v3660_v17, %v3659_v54  ;;  %v3550_v2 = vpop.f32.mrb[54].mxu0  ;;  %v3662_v39 = vpop.f32.mrb[54].mxu1 }
 0x16e   : > { %v3551_v7 = vpop.f32.mrb[55].mxu0  ;;  %v3663_v42 = vpop.f32.mrb[55].mxu1 }
 0x16f   : > { %v5036_v27 = vadd.f32 %v3661_v62, %v3525_v0  ;;  %v5038_v5 = vadd.f32 %v3551_v7, %v3550_v2  ;;  %v3664_v29 = vadd.f32 %v3663_v42, %v3662_v39 }
 0x171   : > { %v5040_v60 = vadd.f32 %v3664_v29, %v3528_v9 }
 0x173   : > { %5308 = vst [vmem:[#allocation2_spill] sm:$0xff] %v5040_v60  ;;  %v3553_v51 = vpop.f32.mrb[56].mxu0  ;;  %v3665_v61 = vpop.f32.mrb[56].mxu1 }
 0x174   : > { %v3554_v33 = vpop.f32.mrb[57].mxu0  ;;  %v3666_v3 = vpop.f32.mrb[57].mxu1 }
 0x175   : > { %v5042_v35 = vadd.f32 %v3554_v33, %v3553_v51  ;;  %v3667_v40 = vadd.f32 %v3666_v3, %v3665_v61  ;;  %v3556_v41 = vpop.f32.mrb[58].mxu0  ;;  %v3668_v46 = vpop.f32.mrb[58].mxu1 }
 0x176   : > { %v3557_v15 = vpop.f32.mrb[59].mxu0  ;;  %v3669_v54 = vpop.f32.mrb[59].mxu1 }
 0x177   : > { %v5044_v25 = vadd.f32 %v3667_v40, %v3531_v44  ;;  %v5046_v0 = vadd.f32 %v3557_v15, %v3556_v41  ;;  %v3670_v17 = vadd.f32 %v3669_v54, %v3668_v46 }
 0x179   : > { %v5048_v62 = vadd.f32 %v3670_v17, %v3534_v56 }
 0x17b   : > { %5309 = vst [vmem:[#allocation3_spill] sm:$0xff] %v5048_v62  ;;  %v3559_v9 = vpop.f32.mrb[60].mxu0  ;;  %v3671_v2 = vpop.f32.mrb[60].mxu1 }
 0x17c   : > { %v3560_v39 = vpop.f32.mrb[61].mxu0  ;;  %v3672_v7 = vpop.f32.mrb[61].mxu1 }
 0x17d   : > { %v5050_v42 = vadd.f32 %v3560_v39, %v3559_v9  ;;  %v3673_v29 = vadd.f32 %v3672_v7, %v3671_v2  ;;  %v3562_v51 = vpop.f32.mrb[62].mxu0  ;;  %v3674_v61 = vpop.f32.mrb[62].mxu1 }
 0x17e   : > { %v3563_v33 = vpop.f32.mrb[63].mxu0  ;;  %v3675_v3 = vpop.f32.mrb[63].mxu1 }
 0x17f   : > { %v5052_v60 = vadd.f32 %v3673_v29, %v3537_v63  ;;  %v5054_v44 = vadd.f32 %v3563_v33, %v3562_v51  ;;  %v3676_v40 = vadd.f32 %v3675_v3, %v3674_v61 }
 0x181   : > { %v5056_v41 = vadd.f32 %v3676_v40, %v3540_v47 }
 0x183   : > { %v3879_v56 = vpop.f32.mrb[64].mxu0  ;;  %v3677_v46 = vpop.f32.mrb[64].mxu1 }
 0x184   : > { %v1080_v15 = vadd.f32 %v3879_v56, %v4937_v37  ;;  %v1071_v54 = vpop.f32.mrb[65].mxu0  ;;  %v3678_v17 = vpop.f32.mrb[65].mxu1 }
 0x185   : > { %v1072_v9 = vadd.f32 %v4929_v32, %v1071_v54  ;;  %v3679_v2 = vadd.f32 %v3678_v17, %v3677_v46  ;;  %v3880_v39 = vpop.f32.mrb[66].mxu0  ;;  %v3680_v7 = vpop.f32.mrb[66].mxu1 }
 0x186   : > { %v5061_v62 = vadd.f32 %v4975_v28, %v1080_v15  ;;  %v1083_v63 = vadd.f32 %v3880_v39, %v4940_v43  ;;  %v1074_v29 = vpop.f32.mrb[67].mxu0  ;;  %v3681_v51 = vpop.f32.mrb[67].mxu1 }
 0x187   : > { %v5065_v47 = vadd.f32 %v4963_v4, %v1072_v9  ;;  %v5068_v61 = vadd.f32 %v3679_v2, %v5026_v1  ;;  %v1075_v37 = vadd.f32 %v4932_v36, %v1074_v29  ;;  %v3682_v33 = vadd.f32 %v3681_v51, %v3680_v7 }
 0x188   : > { %v5072_v32 = vadd.f32 %v4980_v22, %v1083_v63 }
 0x189   : > { %v5075_v3 = vadd.f32 %v4968_v20, %v1075_v37  ;;  %v5078_v28 = vadd.f32 %v3682_v33, %v5030_v13 }
 0x18b   : > { %v3883_v43 = vpop.f32.mrb[68].mxu0  ;;  %v3683_v40 = vpop.f32.mrb[68].mxu1 }
 0x18c   : > { %v1096_v4 = vadd.f32 %v3883_v43, %v4953_v53  ;;  %v1087_v56 = vpop.f32.mrb[69].mxu0  ;;  %v3684_v46 = vpop.f32.mrb[69].mxu1 }
 0x18d   : > { %v1088_v1 = vadd.f32 %v4945_v45, %v1087_v56  ;;  %v3685_v15 = vadd.f32 %v3684_v46, %v3683_v40  ;;  %v3884_v36 = vpop.f32.mrb[70].mxu0  ;;  %v3686_v54 = vpop.f32.mrb[70].mxu1 }
 0x18e   : > { %v5083_v22 = vadd.f32 %v4999_v52, %v1096_v4  ;;  %v1099_v20 = vadd.f32 %v3884_v36, %v4956_v58  ;;  %v1090_v17 = vpop.f32.mrb[71].mxu0  ;;  %v3687_v9 = vpop.f32.mrb[71].mxu1 }
 0x18f   : > { %v5087_v13 = vadd.f32 %v4987_v10, %v1088_v1  ;;  %v5090_v2 = vadd.f32 %v3685_v15, %v5034_v59  ;;  %v1091_v53 = vadd.f32 %v4948_v50, %v1090_v17  ;;  %v3688_v39 = vadd.f32 %v3687_v9, %v3686_v54 }
 0x190   : > { %v5094_v45 = vadd.f32 %v5005_v26, %v1099_v20 }
 0x191   : > { %v5097_v7 = vadd.f32 %v4992_v24, %v1091_v53  ;;  %v5100_v52 = vadd.f32 %v3688_v39, %v5038_v5 }
 0x193   : > { %v3887_v58 = vpop.f32.mrb[72].mxu0  ;;  %v3689_v63 = vpop.f32.mrb[72].mxu1 }
 0x194   : > { %v1112_v10 = vadd.f32 %v3887_v58, %v4973_v55  ;;  %v1103_v29 = vpop.f32.mrb[73].mxu0  ;;  %v3690_v51 = vpop.f32.mrb[73].mxu1 }
 0x195   : > { %v1104_v59 = vadd.f32 %v4961_v31, %v1103_v29  ;;  %v3691_v37 = vadd.f32 %v3690_v51, %v3689_v63  ;;  %v3888_v50 = vpop.f32.mrb[74].mxu0  ;;  %v3692_v33 = vpop.f32.mrb[74].mxu1 }
 0x196   : > { %v5105_v26 = vadd.f32 %v5014_v30, %v1112_v10  ;;  %v1115_v24 = vadd.f32 %v3888_v50, %v4978_v21  ;;  %v1106_v43 = vpop.f32.mrb[75].mxu0  ;;  %v3693_v40 = vpop.f32.mrb[75].mxu1 }
 0x197   : > { %v5109_v5 = vadd.f32 %v5010_v8, %v1104_v59  ;;  %v5112_v4 = vadd.f32 %v3691_v37, %v5042_v35  ;;  %v1107_v55 = vadd.f32 %v4966_v19, %v1106_v43  ;;  %v3694_v56 = vadd.f32 %v3693_v40, %v3692_v33 }
 0x198   : > { %v5116_v31 = vadd.f32 %v5016_v38, %v1115_v24 }
 0x199   : > { %v1668_v46 = vadd.f32 %v5012_v16, %v1107_v55  ;;  %v5120_v30 = vadd.f32 %v3694_v56, %v5046_v0 }
 0x19b   : > { %v3891_v21 = vpop.f32.mrb[76].mxu0  ;;  %v3695_v1 = vpop.f32.mrb[76].mxu1 }
 0x19c   : > { %v1128_v15 = vadd.f32 %v3891_v21, %v4997_v14  ;;  %v1119_v8 = vpop.f32.mrb[77].mxu0  ;;  %v3696_v36 = vpop.f32.mrb[77].mxu1 }
 0x19d   : > { %v1120_v35 = vadd.f32 %v4985_v6, %v1119_v8  ;;  %v3697_v54 = vadd.f32 %v3696_v36, %v3695_v1  ;;  %v3892_v20 = vpop.f32.mrb[78].mxu0  ;;  %v3698_v19 = vpop.f32.mrb[78].mxu1 }
 0x19e   : > { %v5125_v17 = vadd.f32 %v5022_v34, %v1128_v15  ;;  %v1131_v38 = vadd.f32 %v3892_v20, %v5003_v18  ;;  %v1122_v16 = vpop.f32.mrb[79].mxu0  ;;  %v3699_v9 = vpop.f32.mrb[79].mxu1 }
 0x19f   : > { %v1681_v0 = vadd.f32 %v5018_v48, %v1120_v35  ;;  %v5130_v53 = vadd.f32 %v3697_v54, %v5050_v42  ;;  %v1123_v14 = vadd.f32 %v4990_v23, %v1122_v16  ;;  %v3700_v39 = vadd.f32 %v3699_v9, %v3698_v19 }
 0x1a0   : > { %v5134_v6 = vadd.f32 %v5024_v11, %v1131_v38 }
 0x1a1   : > { %v1684_v58 = vadd.f32 %v5020_v57, %v1123_v14  ;;  %v5138_v34 = vadd.f32 %v3700_v39, %v5054_v44 }
 0x1a3   : > { %v3741_v63 = vpop.f32.mrb[80].mxu0 }
 0x1a4   : > { %v3742_v18 = vpop.f32.mrb[81].mxu0 }
 0x1a5   : > { %v3743_v10 = vadd.f32 %v3742_v18, %v3741_v63  ;;  %v3744_v29 = vpop.f32.mrb[82].mxu0 }
 0x1a6   : > { %v3745_v51 = vpop.f32.mrb[83].mxu0 }
 0x1a7   : > { %v3746_v48 = vadd.f32 %v3745_v51, %v3744_v29  ;;  %v5141_v42 = vadd.f32 %v3743_v10, %v5065_v47 }
 0x1a9   : > { %v5144_v23 = vadd.f32 %v3746_v48, %v5075_v3 }
 0x1ab   : > { %v3747_v59 = vpop.f32.mrb[84].mxu0 }
 0x1ac   : > { %v3748_v11 = vpop.f32.mrb[85].mxu0 }
 0x1ad   : > { %v3749_v37 = vadd.f32 %v3748_v11, %v3747_v59  ;;  %v3750_v50 = vpop.f32.mrb[86].mxu0 }
 0x1ae   : > { %v3751_v57 = vpop.f32.mrb[87].mxu0 }
 0x1af   : > { %v3752_v33 = vadd.f32 %v3751_v57, %v3750_v50  ;;  %v4023_v44 = vadd.f32 %v3749_v37, %v5061_v62 }
 0x1b1   : > { %v4031_v24 = vadd.f32 %v3752_v33, %v5072_v32 }
 0x1b3   : > { %v3753_v43 = vpop.f32.mrb[88].mxu0 }
 0x1b4   : > { %v3754_v40 = vpop.f32.mrb[89].mxu0 }
 0x1b5   : > { %v3755_v55 = vadd.f32 %v3754_v40, %v3753_v43  ;;  %v3756_v56 = vpop.f32.mrb[90].mxu0 }
 0x1b6   : > { %v3757_v21 = vpop.f32.mrb[91].mxu0 }
 0x1b7   : > { %v3758_v47 = vadd.f32 %v3757_v21, %v3756_v56  ;;  %v5149_v1 = vadd.f32 %v3755_v55, %v5087_v13 }
 0x1b9   : > { %v5152_v3 = vadd.f32 %v3758_v47, %v5097_v7 }
 0x1bb   : > { %v3759_v15 = vpop.f32.mrb[92].mxu0 }
 0x1bc   : > { %v3760_v8 = vpop.f32.mrb[93].mxu0 }
 0x1bd   : > { %v3761_v36 = vadd.f32 %v3760_v8, %v3759_v15  ;;  %v3762_v35 = vpop.f32.mrb[94].mxu0 }
 0x1be   : > { %v3763_v54 = vpop.f32.mrb[95].mxu0 }
 0x1bf   : > { %v3764_v62 = vadd.f32 %v3763_v54, %v3762_v35  ;;  %v5155_v32 = vadd.f32 %v3761_v36, %v5083_v22 }
 0x1c1   : > { %v5158_v20 = vadd.f32 %v3764_v62, %v5094_v45 }
 0x1c3   : > { %v3765_v19 = vpop.f32.mrb[96].mxu0 }
 0x1c4   : > { %v3766_v38 = vpop.f32.mrb[97].mxu0 }
 0x1c5   : > { %v3767_v16 = vadd.f32 %v3766_v38, %v3765_v19  ;;  %v3768_v13 = vpop.f32.mrb[98].mxu0 }
 0x1c6   : > { %v3769_v9 = vpop.f32.mrb[99].mxu0 }
 0x1c7   : > { %v3770_v14 = vadd.f32 %v3769_v9, %v3768_v13  ;;  %v5161_v7 = vadd.f32 %v3767_v16, %v5109_v5 }
 0x1c9   : > { %v5163_v39 = vadd.f32 %v3770_v14, %v1668_v46 }
 0x1cb   : > { %v3771_v63 = vpop.f32.mrb[100].mxu0 }
 0x1cc   : > { %v3772_v18 = vpop.f32.mrb[101].mxu0 }
 0x1cd   : > { %v3773_v10 = vadd.f32 %v3772_v18, %v3771_v63  ;;  %v3774_v29 = vpop.f32.mrb[102].mxu0 }
 0x1ce   : > { %v3775_v22 = vpop.f32.mrb[103].mxu0 }
 0x1cf   : > { %v3776_v51 = vadd.f32 %v3775_v22, %v3774_v29  ;;  %v5166_v45 = vadd.f32 %v3773_v10, %v5105_v26 }
 0x1d1   : > { %v5169_v48 = vadd.f32 %v3776_v51, %v5116_v31 }
 0x1d3   : > { %v3777_v59 = vpop.f32.mrb[104].mxu0 }
 0x1d4   : > { %v3778_v11 = vpop.f32.mrb[105].mxu0 }
 0x1d5   : > { %v3779_v37 = vadd.f32 %v3778_v11, %v3777_v59  ;;  %v3780_v5 = vpop.f32.mrb[106].mxu0 }
 0x1d6   : > { %v3781_v50 = vpop.f32.mrb[107].mxu0 }
 0x1d7   : > { %v3782_v46 = vadd.f32 %v3781_v50, %v3780_v5  ;;  %v5171_v57 = vadd.f32 %v3779_v37, %v1681_v0  ;;  %v5185_v0 = vld [vmem:[%s5306_s2] ss:$0 sm:$0xff] }
 0x1d9   : > { %v5173_v33 = vadd.f32 %v3782_v46, %v1684_v58 }
 0x1db   : > { %v3783_v43 = vpop.f32.mrb[108].mxu0 }
 0x1dc   : > { %v3784_v40 = vpop.f32.mrb[109].mxu0 }
 0x1dd   : > { %v3785_v55 = vadd.f32 %v3784_v40, %v3783_v43  ;;  %v3786_v56 = vpop.f32.mrb[110].mxu0 }
 0x1de   : > { %v3787_v26 = vpop.f32.mrb[111].mxu0 }
 0x1df   : > { %v3788_v21 = vadd.f32 %v3787_v26, %v3786_v56  ;;  %v5176_v31 = vadd.f32 %v3785_v55, %v5125_v17  ;;  %v5310_v26 = vld [vmem:[#allocation2_spill] sm:$0xff] }
 0x1e1   : > { %v5179_v47 = vadd.f32 %v3788_v21, %v5134_v6 }
 0x1e3   : > { %v3789_v15 = vpop.f32.mrb[112].mxu0  ;;  %v3975_v8 = vpop.f32.mrb[80].mxu1 }
 0x1e4   : > { %v4024_v58 = vadd.f32 %v4023_v44, %v3975_v8  ;;  %v3790_v36 = vpop.f32.mrb[113].mxu0  ;;  %v2632_v35 = vpop.f32.mrb[81].mxu1 }
 0x1e5   : > { %v3791_v17 = vadd.f32 %v3790_v36, %v3789_v15  ;;  %v4028_v6 = vadd.f32 %v5141_v42, %v2632_v35  ;;  %v3792_v54 = vpop.f32.mrb[114].mxu0  ;;  %v3976_v62 = vpop.f32.mrb[82].mxu1 }
 0x1e6   : > { %v2800_v19 = vadd.f32 %v4024_v58, %v5185_v0  ;;  %v4032_v38 = vadd.f32 %v4031_v24, %v3976_v62  ;;  %v3793_v44 = vpop.f32.mrb[115].mxu0  ;;  %v2635_v16 = vpop.f32.mrb[83].mxu1 }
 0x1e7   : > { %v2798_v13 = vadd.f32 %v4028_v6, %v5185_v0  ;;  %v3794_v9 = vadd.f32 %v3793_v44, %v3792_v54  ;;  %v4036_v14 = vadd.f32 %v5144_v23, %v2635_v16  ;;  %v5197_v63 = vadd.f32 %v5028_v12, %v3791_v17 }
 0x1e8   : > { %2832 = vst [vmem:[%s5190_s7 + $0x10] sm:$0xff] %v2800_v19  ;;  %v2801_v42 = vadd.f32 %v4032_v38, %v5185_v0 }
 0x1e9   : > { %2830 = vst [vmem:[%s5190_s7] sm:$0xff] %v2798_v13  ;;  %v2799_v18 = vadd.f32 %v4036_v14, %v5185_v0  ;;  %v5204_v10 = vadd.f32 %v5032_v49, %v3794_v9  ;;  %v5311_v9 = vld [vmem:[#allocation3_spill] sm:$0xff] }
 0x1ea   : > { %2833 = vst [vmem:[%s5190_s7 + $0x18] sm:$0xff] %v2801_v42 }
 0x1eb   : > { %2831 = vst [vmem:[%s5190_s7 + $0x8] sm:$0xff] %v2799_v18  ;;  %v3795_v24 = vpop.f32.mrb[116].mxu0  ;;  %v3979_v29 = vpop.f32.mrb[84].mxu1 }
 0x1ec   : > { %v4040_v22 = vadd.f32 %v5155_v32, %v3979_v29  ;;  %v3796_v23 = vpop.f32.mrb[117].mxu0  ;;  %v2648_v12 = vpop.f32.mrb[85].mxu1 }
 0x1ed   : > { %v3797_v51 = vadd.f32 %v3796_v23, %v3795_v24  ;;  %v4044_v59 = vadd.f32 %v5149_v1, %v2648_v12  ;;  %v3798_v11 = vpop.f32.mrb[118].mxu0  ;;  %v3980_v37 = vpop.f32.mrb[86].mxu1 }
 0x1ee   : > { %v2804_v49 = vadd.f32 %v4040_v22, %v5185_v0  ;;  %v4048_v5 = vadd.f32 %v5158_v20, %v3980_v37  ;;  %v3799_v50 = vpop.f32.mrb[119].mxu0  ;;  %v2651_v46 = vpop.f32.mrb[87].mxu1 }
 0x1ef   : > { %v2802_v43 = vadd.f32 %v4044_v59, %v5185_v0  ;;  %v3800_v40 = vadd.f32 %v3799_v50, %v3798_v11  ;;  %v4052_v32 = vadd.f32 %v5152_v3, %v2651_v46  ;;  %v4086_v55 = vadd.f32 %v5036_v27, %v3797_v51 }
 0x1f0   : > { %2836 = vst [vmem:[%s5190_s7 + $0x30] sm:$0xff] %v2804_v49  ;;  %v2805_v1 = vadd.f32 %v4048_v5, %v5185_v0 }
 0x1f1   : > { %2834 = vst [vmem:[%s5190_s7 + $0x20] sm:$0xff] %v2802_v43  ;;  %v2803_v56 = vadd.f32 %v4052_v32, %v5185_v0  ;;  %v4092_v21 = vadd.f32 %v5310_v26, %v3800_v40 }
 0x1f2   : > { %2837 = vst [vmem:[%s5190_s7 + $0x38] sm:$0xff] %v2805_v1 }
 0x1f3   : > { %2835 = vst [vmem:[%s5190_s7 + $0x28] sm:$0xff] %v2803_v56  ;;  %v3801_v20 = vpop.f32.mrb[120].mxu0  ;;  %v3983_v15 = vpop.f32.mrb[88].mxu1 }
 0x1f4   : > { %v4056_v8 = vadd.f32 %v5166_v45, %v3983_v15  ;;  %v3802_v58 = vpop.f32.mrb[121].mxu0  ;;  %v2664_v3 = vpop.f32.mrb[89].mxu1 }
 0x1f5   : > { %v3803_v36 = vadd.f32 %v3802_v58, %v3801_v20  ;;  %v4060_v27 = vadd.f32 %v5161_v7, %v2664_v3  ;;  %v3804_v35 = vpop.f32.mrb[122].mxu0  ;;  %v3984_v17 = vpop.f32.mrb[90].mxu1 }
 0x1f6   : > { %v2808_v6 = vadd.f32 %v4056_v8, %v5185_v0  ;;  %v4064_v54 = vadd.f32 %v5169_v48, %v3984_v17  ;;  %v3805_v62 = vpop.f32.mrb[123].mxu0  ;;  %v2667_v19 = vpop.f32.mrb[91].mxu1 }
 0x1f7   : > { %v2806_v38 = vadd.f32 %v4060_v27, %v5185_v0  ;;  %v3806_v44 = vadd.f32 %v3805_v62, %v3804_v35  ;;  %v4068_v45 = vadd.f32 %v5163_v39, %v2667_v19  ;;  %v4101_v16 = vadd.f32 %v5044_v25, %v3803_v36 }
 0x1f8   : > { %2840 = vst [vmem:[%s5190_s7 + $0x50] sm:$0xff] %v2808_v6  ;;  %v2809_v7 = vadd.f32 %v4064_v54, %v5185_v0 }
 0x1f9   : > { %2838 = vst [vmem:[%s5190_s7 + $0x40] sm:$0xff] %v2806_v38  ;;  %v2807_v13 = vadd.f32 %v4068_v45, %v5185_v0  ;;  %v5234_v14 = vadd.f32 %v5311_v9, %v3806_v44 }
 0x1fa   : > { %2841 = vst [vmem:[%s5190_s7 + $0x58] sm:$0xff] %v2809_v7 }
 0x1fb   : > { %2839 = vst [vmem:[%s5190_s7 + $0x48] sm:$0xff] %v2807_v13  ;;  %v3807_v48 = vpop.f32.mrb[124].mxu0  ;;  %v3987_v42 = vpop.f32.mrb[92].mxu1 }
 0x1fc   : > { %v4072_v18 = vadd.f32 %v5176_v31, %v3987_v42  ;;  %v3808_v24 = vpop.f32.mrb[125].mxu0  ;;  %v2680_v39 = vpop.f32.mrb[93].mxu1 }
 0x1fd   : > { %v3809_v25 = vadd.f32 %v3808_v24, %v3807_v48  ;;  %v4076_v29 = vadd.f32 %v5171_v57, %v2680_v39  ;;  %v3810_v22 = vpop.f32.mrb[126].mxu0  ;;  %v3988_v23 = vpop.f32.mrb[94].mxu1 }
 0x1fe   : > { %v2812_v12 = vadd.f32 %v4072_v18, %v5185_v0  ;;  %v4080_v51 = vadd.f32 %v5179_v47, %v3988_v23  ;;  %v3811_v59 = vpop.f32.mrb[127].mxu0  ;;  %v2683_v11 = vpop.f32.mrb[95].mxu1 }
 0x1ff   : > { %v2810_v37 = vadd.f32 %v4076_v29, %v5185_v0  ;;  %v3812_v49 = vadd.f32 %v3811_v59, %v3810_v22  ;;  %v4084_v31 = vadd.f32 %v5173_v33, %v2683_v11  ;;  %v4098_v5 = vadd.f32 %v5052_v60, %v3809_v25 }
 0x200   : > { %2844 = vst [vmem:[%s5190_s7 + $0x70] sm:$0xff] %v2812_v12  ;;  %v2813_v57 = vadd.f32 %v4080_v51, %v5185_v0 }
 0x201   : > { %2842 = vst [vmem:[%s5190_s7 + $0x60] sm:$0xff] %v2810_v37  ;;  %v2811_v50 = vadd.f32 %v4084_v31, %v5185_v0  ;;  %v4104_v46 = vadd.f32 %v5056_v41, %v3812_v49 }
 0x202   : > { %2845 = vst [vmem:[%s5190_s7 + $0x78] sm:$0xff] %v2813_v57 }
 0x203   : > { %2843 = vst [vmem:[%s5190_s7 + $0x68] sm:$0xff] %v2811_v50  ;;  %v3813_v47 = vpop.f32.mrb[128].mxu0  ;;  %v3991_v43 = vpop.f32.mrb[0].mxu1 }
 0x204   : > { %v4087_v40 = vadd.f32 %v4086_v55, %v3991_v43  ;;  %v3814_v32 = vpop.f32.mrb[129].mxu0  ;;  %v2696_v1 = vpop.f32.mrb[1].mxu1 }
 0x205   : > { %v3815_v33 = vadd.f32 %v3814_v32, %v3813_v47  ;;  %v4090_v60 = vadd.f32 %v5197_v63, %v2696_v1  ;;  %v3816_v56 = vpop.f32.mrb[130].mxu0  ;;  %v3992_v26 = vpop.f32.mrb[2].mxu1 }
 0x206   : > { %v2816_v20 = vadd.f32 %v4087_v40, %v5185_v0  ;;  %v4093_v15 = vadd.f32 %v4092_v21, %v3992_v26  ;;  %v3817_v41 = vpop.f32.mrb[131].mxu0  ;;  %v2699_v8 = vpop.f32.mrb[3].mxu1 }
 0x207   : > { %v2814_v58 = vadd.f32 %v4090_v60, %v5185_v0  ;;  %v3818_v3 = vadd.f32 %v3817_v41, %v3816_v56  ;;  %v4096_v55 = vadd.f32 %v5204_v10, %v2699_v8  ;;  %v4113_v36 = vadd.f32 %v5068_v61, %v3815_v33 }
 0x208   : > { %2848 = vst [vmem:[%s5190_s7 + $0x90] sm:$0xff] %v2816_v20  ;;  %v2817_v27 = vadd.f32 %v4093_v15, %v5185_v0 }
 0x209   : > { %2846 = vst [vmem:[%s5190_s7 + $0x80] sm:$0xff] %v2814_v58  ;;  %v2815_v63 = vadd.f32 %v4096_v55, %v5185_v0  ;;  %v4119_v35 = vadd.f32 %v5078_v28, %v3818_v3 }
 0x20a   : > { %2849 = vst [vmem:[%s5190_s7 + $0x98] sm:$0xff] %v2817_v27 }
 0x20b   : > { %2847 = vst [vmem:[%s5190_s7 + $0x88] sm:$0xff] %v2815_v63  ;;  %v3819_v21 = vpop.f32.mrb[132].mxu0  ;;  %v3995_v17 = vpop.f32.mrb[4].mxu1 }
 0x20c   : > { %v4099_v6 = vadd.f32 %v4098_v5, %v3995_v17  ;;  %v3820_v54 = vpop.f32.mrb[133].mxu0  ;;  %v2712_v62 = vpop.f32.mrb[5].mxu1 }
 0x20d   : > { %v3821_v10 = vadd.f32 %v3820_v54, %v3819_v21  ;;  %v4102_v19 = vadd.f32 %v4101_v16, %v2712_v62  ;;  %v3822_v61 = vpop.f32.mrb[134].mxu0  ;;  %v3996_v38 = vpop.f32.mrb[6].mxu1 }
 0x20e   : > { %v2820_v44 = vadd.f32 %v4099_v6, %v5185_v0  ;;  %v4105_v45 = vadd.f32 %v4104_v46, %v3996_v38  ;;  %v3823_v7 = vpop.f32.mrb[135].mxu0  ;;  %v2715_v28 = vpop.f32.mrb[7].mxu1 }
 0x20f   : > { %v2818_v13 = vadd.f32 %v4102_v19, %v5185_v0  ;;  %v3824_v9 = vadd.f32 %v3823_v7, %v3822_v61  ;;  %v4108_v48 = vadd.f32 %v5234_v14, %v2715_v28  ;;  %v4110_v42 = vadd.f32 %v5090_v2, %v3821_v10 }
 0x210   : > { %2852 = vst [vmem:[%s5190_s7 + $0xb0] sm:$0xff] %v2820_v44  ;;  %v2821_v18 = vadd.f32 %v4105_v45, %v5185_v0 }
 0x211   : > { %2850 = vst [vmem:[%s5190_s7 + $0xa0] sm:$0xff] %v2818_v13  ;;  %v2819_v16 = vadd.f32 %v4108_v48, %v5185_v0  ;;  %v4116_v24 = vadd.f32 %v5100_v52, %v3824_v9 }
 0x212   : > { %2853 = vst [vmem:[%s5190_s7 + $0xb8] sm:$0xff] %v2821_v18 }
 0x213   : > { %2851 = vst [vmem:[%s5190_s7 + $0xa8] sm:$0xff] %v2819_v16  ;;  %v3825_v39 = vpop.f32.mrb[136].mxu0  ;;  %v3999_v25 = vpop.f32.mrb[8].mxu1 }
 0x214   : > { %v4111_v29 = vadd.f32 %v4110_v42, %v3999_v25  ;;  %v3826_v22 = vpop.f32.mrb[137].mxu0  ;;  %v2728_v23 = vpop.f32.mrb[9].mxu1 }
 0x215   : > { %v3827_v14 = vadd.f32 %v3826_v22, %v3825_v39  ;;  %v4114_v12 = vadd.f32 %v4113_v36, %v2728_v23  ;;  %v3828_v2 = vpop.f32.mrb[138].mxu0  ;;  %v4000_v51 = vpop.f32.mrb[10].mxu1 }
 0x216   : > { %v2824_v59 = vadd.f32 %v4111_v29, %v5185_v0  ;;  %v4117_v11 = vadd.f32 %v4116_v24, %v4000_v51  ;;  %v3829_v37 = vpop.f32.mrb[139].mxu0  ;;  %v2731_v52 = vpop.f32.mrb[11].mxu1 }
 0x217   : > { %v2822_v49 = vadd.f32 %v4114_v12, %v5185_v0  ;;  %v3830_v31 = vadd.f32 %v3829_v37, %v3828_v2  ;;  %v4120_v5 = vadd.f32 %v4119_v35, %v2731_v52  ;;  %v4125_v57 = vadd.f32 %v5112_v4, %v3827_v14 }
 0x218   : > { %2856 = vst [vmem:[%s5190_s7 + $0xd0] sm:$0xff] %v2824_v59  ;;  %v2825_v50 = vadd.f32 %v4117_v11, %v5185_v0 }
 0x219   : > { %2854 = vst [vmem:[%s5190_s7 + $0xc0] sm:$0xff] %v2822_v49  ;;  %v2823_v46 = vadd.f32 %v4120_v5, %v5185_v0  ;;  %v4131_v47 = vadd.f32 %v5120_v30, %v3830_v31 }
 0x21a   : > { %2857 = vst [vmem:[%s5190_s7 + $0xd8] sm:$0xff] %v2825_v50 }
 0x21b   : > { %2855 = vst [vmem:[%s5190_s7 + $0xc8] sm:$0xff] %v2823_v46  ;;  %v3831_v43 = vpop.f32.mrb[140].mxu0  ;;  %v4003_v40 = vpop.f32.mrb[12].mxu1 }
 0x21c   : > { %v3832_v32 = vpop.f32.mrb[141].mxu0  ;;  %v2744_v1 = vpop.f32.mrb[13].mxu1 }
 0x21d   : > { %v3833_v33 = vadd.f32 %v3832_v32, %v3831_v43  ;;  %v4126_v60 = vadd.f32 %v4125_v57, %v2744_v1  ;;  %v3834_v4 = vpop.f32.mrb[142].mxu0  ;;  %v4004_v56 = vpop.f32.mrb[14].mxu1 }
 0x21e   : > { %v3835_v26 = vpop.f32.mrb[143].mxu0  ;;  %v2747_v20 = vpop.f32.mrb[15].mxu1 }
 0x21f   : > { %v4122_v15 = vadd.f32 %v5130_v53, %v3833_v33  ;;  %v2826_v30 = vadd.f32 %v4126_v60, %v5185_v0  ;;  %v3836_v41 = vadd.f32 %v3835_v26, %v3834_v4  ;;  %v4132_v8 = vadd.f32 %v4131_v47, %v2747_v20 }
 0x221   : > { %v4123_v58 = vadd.f32 %v4122_v15, %v4003_v40  ;;  %2858 = vst [vmem:[%s5190_s7 + $0xe0] sm:$0xff] %v2826_v30  ;;  %v4128_v3 = vadd.f32 %v5138_v34, %v3836_v41  ;;  %v2827_v55 = vadd.f32 %v4132_v8, %v5185_v0 }
 0x223   : > { %v2828_v36 = vadd.f32 %v4123_v58, %v5185_v0  ;;  %v4129_v27 = vadd.f32 %v4128_v3, %v4004_v56  ;;  %2859 = vst [vmem:[%s5190_s7 + $0xe8] sm:$0xff] %v2827_v55 }
 0x225   : > { %2860 = vst [vmem:[%s5190_s7 + $0xf0] sm:$0xff] %v2828_v36  ;;  %v2829_v63 = vadd.f32 %v4129_v27, %v5185_v0 }
 0x227   : > { %2861 = vst [vmem:[%s5190_s7 + $0xf8] sm:$0xff] %v2829_v63 }
 0x228 PF: > { %s13_s14 = sadd.s32 1, %s4402_s14   ;;  %s5312_s12 = smov %s4398_s13 }
 0x229   : > { %p10_p5 = scmp.ge.s32.totalorder %s13_s14, 4   ;;  %s5313_s13 = smov %s5315_s15 }
 0x22b   :  { %12 = sbr.rel (!%p10_p5) target bundleno = 2 (0x2), region = 73 }

</bundles_post_ra>
